<compile_context>
chip_gen: v6e
topology: v6e:2x2x1
jax: 0.10.0
libtpu: 0.0.40
codegen_flags: <defaults>
</compile_context>

<pallas_src>
import functools

import jax
import jax.numpy as jnp
from jax import lax
from jax.experimental import pallas as pl
from jax.experimental.pallas import tpu as pltpu

_BIG = 3.0e38          # sentinel key (larger than any real packed d2, < inf)
_KPAD = 128            # lane width of the running top-k buffer / output block


def _periodic_knn_kernel(pos_col_ref, pos_row_ref, nbr_ref, topk_ref, *,
                         k, box, inv_box, ndim, tm, tk, n_actual, idx_bits):
    """Grid step (i, j): query-row tile i vs. key-column chunk j."""
    i = pl.program_id(0)          # row (query) tile        -> "parallel"
    j = pl.program_id(1)          # key chunk (reduction)   -> "arbitrary"
    nj = pl.num_programs(1)
    big = jnp.float32(_BIG)

    @pl.when(j == 0)
    def _init():
        topk_ref[...] = jnp.full_like(topk_ref, big)

    # --- periodic (minimum-image) squared distances for this tile: [tm, tk] ---
    d2 = jnp.zeros((tm, tk), jnp.float32)
    for d in range(ndim):                      # D is tiny (2/3): static unroll
        ci = pos_col_ref[:, d:d + 1]           # [tm, 1]
        rj = pos_row_ref[d:d + 1, :]           # [1, tk]
        delta = ci - rj                        # [tm, tk] VPU broadcast
        delta = delta - box * jnp.floor(delta * inv_box + 0.5)
        d2 = d2 + delta * delta

    col_global = lax.broadcasted_iota(jnp.int32, (tm, tk), 1) + j * tk   # [tm, tk]
    row_global = lax.broadcasted_iota(jnp.int32, (tm, 1), 0) + i * tm    # [tm, 1]

    # --- pack column index into the low mantissa bits of d2 (d2 >= 0, finite) ---
    # key ordering == quantized-distance ordering, ties broken by lowest index.
    keys_i = (pltpu.bitcast(d2, jnp.int32) & jnp.int32(-(1 << idx_bits))) | col_global
    keys = pltpu.bitcast(keys_i, jnp.float32)
    # Self-loop + column-padding mask.  Not gated per-chunk: it is a handful of
    # VPU compare/selects per vreg and the VPU has slack (XLU binds).
    invalid = (col_global == row_global) | (col_global >= n_actual)
    keys = jnp.where(invalid, big, keys)

    # --- merge this chunk with the running top-k: ONE XLU reduce per pick -----
    # The running buffer is lane-concatenated onto the chunk keys, so the vreg
    # folding that feeds the cross-lane min absorbs it for free (VPU), and the
    # single invalidation select covers both.
    run = topk_ref[...]                                    # [tm, _KPAD]
    all_keys = jnp.concatenate([keys, run], axis=1)        # [tm, tk + _KPAD]
    lane_t = lax.broadcasted_iota(jnp.int32, (tm, _KPAD), 1)
    new_topk = jnp.full((tm, _KPAD), big, jnp.float32)
    for t in range(k):
        picked = jnp.min(all_keys, axis=1, keepdims=True)      # [tm, 1] single reduce
        new_topk = jnp.where(lane_t == t, picked, new_topk)    # VPU select into lane t
        all_keys = jnp.where(all_keys == picked, big, all_keys)
    topk_ref[...] = new_topk                               # one full-width store

    @pl.when(j == nj - 1)
    def _finalize():
        # Lane-dense (tm, 128) int32 output: full-vreg unmasked stores; the
        # wrapper slices [:, :k] host-side.
        low_mask = jnp.int32((1 << idx_bits) - 1)
        nbr_ref[...] = pltpu.bitcast(new_topk, jnp.int32) & low_mask


def periodic_knn_graph(pos, k=17, box=1.0, tm=16, tk=1024):
    """Pallas-backed equivalent of create_periodic_knn_graph(datapoint, k)."""
    pos = jnp.asarray(pos, jnp.float32)
    N, D = pos.shape
    assert 1 <= k <= _KPAD and k < N and k < tk, "need k <= 128, k < N, k < tk"
    assert D <= 8, "coordinate dim padded to 8"
    Dp = 8

    Nr = ((N + tm - 1) // tm) * tm          # query rows padded to the row tile
    Nc = ((N + tk - 1) // tk) * tk          # key columns padded to the chunk size
    idx_bits = max(1, int(Nc - 1).bit_length())
    # Keep >= 9 distance mantissa bits; larger N needs a two-word compare path.
    assert idx_bits <= 14, "index packing would quantize distances too coarsely"

    pos_col = jnp.zeros((Nr, Dp), jnp.float32).at[:N, :D].set(pos)      # [Nr, 8]
    pos_row = jnp.zeros((Dp, Nc), jnp.float32).at[:D, :N].set(pos.T)    # [8, Nc]

    kernel = functools.partial(
        _periodic_knn_kernel,
        k=int(k), box=float(box), inv_box=float(1.0 / box), ndim=int(D),
        tm=int(tm), tk=int(tk), n_actual=int(N), idx_bits=int(idx_bits))

    nbr_full = pl.pallas_call(
        kernel,
        out_shape=jax.ShapeDtypeStruct((Nr, _KPAD), jnp.int32),   # lane-dense output
        grid_spec=pltpu.PrefetchScalarGridSpec(
            num_scalar_prefetch=0,
            grid=(Nr // tm, Nc // tk),
            in_specs=[
                pl.BlockSpec((tm, Dp), lambda i, j: (i, 0)),   # query-row tile
                pl.BlockSpec((Dp, tk), lambda i, j: (0, j)),   # key-column chunk
            ],
            out_specs=pl.BlockSpec((tm, _KPAD), lambda i, j: (i, 0)),
            scratch_shapes=[pltpu.VMEM((tm, _KPAD), jnp.float32)],  # running top-k keys
        ),
        compiler_params=pltpu.CompilerParams(
            dimension_semantics=("parallel", "arbitrary")),
    )(pos_col, pos_row)

    nbr = nbr_full[:N, :k]

    # PyG knn_graph convention (flow="source_to_target"):
    # edge_index[0] = neighbor (source), edge_index[1] = center node (target)
    targets = jnp.repeat(jnp.arange(N, dtype=jnp.int32), k)
    sources = nbr.reshape(-1)
    edge_index = jnp.stack([sources, targets], axis=0)
    return edge_index, nbr


def _reference_knn(pos, k, box):
    """Pure-JAX reference (exact) for correctness checking."""
    pos = jnp.asarray(pos, jnp.float32)
    N = pos.shape[0]
    delta = pos[:, None, :] - pos[None, :, :]
    delta = delta - box * jnp.floor(delta / box + 0.5)
    d2 = jnp.sum(delta * delta, axis=-1)
    d2 = jnp.where(jnp.eye(N, dtype=bool), jnp.inf, d2)
    return jnp.argsort(d2, axis=1)[:, :k], d2


def _check(pos, cfg):
    N, k, box = cfg["N"], cfg["k"], cfg["box"]
    kw = {kk: cfg[kk] for kk in ("tm", "tk") if kk in cfg}
    edge_index, nbr = periodic_knn_graph(pos, k=k, box=box, **kw)
    edge_index = jax.block_until_ready(edge_index)
    nbr = jax.block_until_ready(nbr)

    assert edge_index.shape == (2, N * k) and edge_index.dtype == jnp.int32
    assert nbr.shape == (N, k) and nbr.dtype == jnp.int32

    ref_idx, d2 = _reference_knn(pos, k, box)
    rows = jnp.arange(N)[:, None]

    # structural checks: valid range, no self-loops, unique neighbors per node
    assert bool(jnp.all((nbr >= 0) & (nbr < N))), "neighbor index out of range"
    assert bool(jnp.all(nbr != rows)), "self-loop produced"
    nbr_sorted = jnp.sort(nbr, axis=1)
    assert bool(jnp.all(nbr_sorted[:, 1:] != nbr_sorted[:, :-1])), "duplicate neighbor"

    # neighbor-set distances must match the exact reference top-k distances
    # (rtol tolerates the packed-key mantissa quantization at the k-th boundary)
    picked_d2 = jnp.sort(d2[rows, nbr], axis=1)
    ref_d2 = jnp.sort(d2[rows, ref_idx], axis=1)
    assert bool(jnp.allclose(picked_d2, ref_d2, rtol=1e-3, atol=1e-6)), \
        "neighbor distances disagree with reference"

    # edge_index convention
    assert bool(jnp.all(edge_index[1] == jnp.repeat(jnp.arange(N, dtype=jnp.int32), k)))
    assert bool(jnp.all(edge_index[0] == nbr.reshape(-1)))


if __name__ == "__main__":
    key = jax.random.PRNGKey(0)
    configs = [
        # multi-chunk reduction path with default tiles (tm=16, tk=1024), ragged N
        dict(N=1500, D=3, k=17, box=1.0),
        # ragged N, single key chunk: padded rows/cols + in-kernel masking
        dict(N=300, D=2, k=17, box=1.0),
        # small explicit chunks: exercises repeated running-top-k merges
        dict(N=512, D=3, k=17, box=1.0, tm=32, tk=256),
    ]
    for cfg in configs:
        key, sub = jax.random.split(key)
        pos = jax.random.uniform(sub, (cfg["N"], cfg["D"]), dtype=jnp.float32) * cfg["box"]
        _check(pos, cfg)

    print("KERNEL_OK")
</pallas_src>

<mosaic_0001>
module attributes {stable_mosaic.version = 11 : i64} {
  func.func @_periodic_knn_kernel(%arg0: i32, %arg1: i32, %arg2: memref<16x8xf32, #tpu.memory_space<vmem>>, %arg3: memref<8x1024xf32, #tpu.memory_space<vmem>>, %arg4: memref<16x128xi32, #tpu.memory_space<vmem>>, %arg5: memref<16x128xf32, #tpu.memory_space<vmem>>) attributes {dimension_semantics = [#tpu.dimension_semantics<parallel>, #tpu.dimension_semantics<arbitrary>], iteration_bounds = array<i64: 94, 2>, scalar_prefetch = 0 : i64, scratch_operands = 1 : i64, tpu.core_type = #tpu.core_type<tc>, window_params = [{transform_indices = @transform_0, window_bounds = array<i64: 16, 8>}, {transform_indices = @transform_1, window_bounds = array<i64: 8, 1024>}, {transform_indices = @transform_2, window_bounds = array<i64: 16, 128>}]} {
    %c0_i32 = arith.constant 0 : i32
    %0 = arith.cmpi eq, %arg1, %c0_i32 : i32
    %1 = arith.extui %0 : i1 to i32
    %cst = arith.constant 3.000000e+38 : f32
    %c0_i32_0 = arith.constant 0 : i32
    %2 = arith.cmpi ne, %1, %c0_i32_0 : i32
    scf.if %2 {
      %260 = vector.broadcast %cst : f32 to vector<16x128xf32>
      %c0_63 = arith.constant 0 : index
      %c0_64 = arith.constant 0 : index
      %261 = vector.load %arg5[%c0_63, %c0_64] : memref<16x128xf32, #tpu.memory_space<vmem>>, vector<16x128xf32>
      tpu.vector_store %arg5[%c0_63, %c0_64], %260 {strides = array<i32>} : memref<16x128xf32, #tpu.memory_space<vmem>>, vector<16x128xf32>,
    } else {
    }
    %cst_1 = arith.constant 0.000000e+00 : f32
    %3 = vector.broadcast %cst_1 : f32 to vector<16x1024xf32>
    %c0 = arith.constant 0 : index
    %c0_2 = arith.constant 0 : index
    %4 = vector.load %arg2[%c0, %c0_2] : memref<16x8xf32, #tpu.memory_space<vmem>>, vector<16x1xf32>
    %c0_3 = arith.constant 0 : index
    %c0_4 = arith.constant 0 : index
    %5 = vector.load %arg3[%c0_3, %c0_4] : memref<8x1024xf32, #tpu.memory_space<vmem>>, vector<1x1024xf32>
    %6 = vector.broadcast %4 : vector<16x1xf32> to vector<16x1024xf32>
    %7 = vector.broadcast %5 : vector<1x1024xf32> to vector<16x1024xf32>
    %8 = arith.subf %6, %7 : vector<16x1024xf32>
    %cst_5 = arith.constant 1.000000e+00 : f32
    %9 = vector.broadcast %cst_5 : f32 to vector<16x1024xf32>
    %10 = arith.mulf %8, %9 : vector<16x1024xf32>
    %cst_6 = arith.constant 5.000000e-01 : f32
    %11 = vector.broadcast %cst_6 : f32 to vector<16x1024xf32>
    %12 = arith.addf %10, %11 : vector<16x1024xf32>
    %13 = math.floor %12 : vector<16x1024xf32>
    %cst_7 = arith.constant 1.000000e+00 : f32
    %14 = vector.broadcast %cst_7 : f32 to vector<16x1024xf32>
    %15 = arith.mulf %14, %13 : vector<16x1024xf32>
    %16 = arith.subf %8, %15 : vector<16x1024xf32>
    %17 = arith.mulf %16, %16 : vector<16x1024xf32>
    %18 = arith.addf %3, %17 : vector<16x1024xf32>
    %c0_8 = arith.constant 0 : index
    %c1 = arith.constant 1 : index
    %19 = vector.load %arg2[%c0_8, %c1] : memref<16x8xf32, #tpu.memory_space<vmem>>, vector<16x1xf32>
    %c1_9 = arith.constant 1 : index
    %c0_10 = arith.constant 0 : index
    %20 = vector.load %arg3[%c1_9, %c0_10] : memref<8x1024xf32, #tpu.memory_space<vmem>>, vector<1x1024xf32>
    %21 = vector.broadcast %19 : vector<16x1xf32> to vector<16x1024xf32>
    %22 = vector.broadcast %20 : vector<1x1024xf32> to vector<16x1024xf32>
    %23 = arith.subf %21, %22 : vector<16x1024xf32>
    %cst_11 = arith.constant 1.000000e+00 : f32
    %24 = vector.broadcast %cst_11 : f32 to vector<16x1024xf32>
    %25 = arith.mulf %23, %24 : vector<16x1024xf32>
    %cst_12 = arith.constant 5.000000e-01 : f32
    %26 = vector.broadcast %cst_12 : f32 to vector<16x1024xf32>
    %27 = arith.addf %25, %26 : vector<16x1024xf32>
    %28 = math.floor %27 : vector<16x1024xf32>
    %cst_13 = arith.constant 1.000000e+00 : f32
    %29 = vector.broadcast %cst_13 : f32 to vector<16x1024xf32>
    %30 = arith.mulf %29, %28 : vector<16x1024xf32>
    %31 = arith.subf %23, %30 : vector<16x1024xf32>
    %32 = arith.mulf %31, %31 : vector<16x1024xf32>
    %33 = arith.addf %18, %32 : vector<16x1024xf32>
    %c0_14 = arith.constant 0 : index
    %c2 = arith.constant 2 : index
    %34 = vector.load %arg2[%c0_14, %c2] : memref<16x8xf32, #tpu.memory_space<vmem>>, vector<16x1xf32>
    %c2_15 = arith.constant 2 : index
    %c0_16 = arith.constant 0 : index
    %35 = vector.load %arg3[%c2_15, %c0_16] : memref<8x1024xf32, #tpu.memory_space<vmem>>, vector<1x1024xf32>
    %36 = vector.broadcast %34 : vector<16x1xf32> to vector<16x1024xf32>
    %37 = vector.broadcast %35 : vector<1x1024xf32> to vector<16x1024xf32>
    %38 = arith.subf %36, %37 : vector<16x1024xf32>
    %cst_17 = arith.constant 1.000000e+00 : f32
    %39 = vector.broadcast %cst_17 : f32 to vector<16x1024xf32>
    %40 = arith.mulf %38, %39 : vector<16x1024xf32>
    %cst_18 = arith.constant 5.000000e-01 : f32
    %41 = vector.broadcast %cst_18 : f32 to vector<16x1024xf32>
    %42 = arith.addf %40, %41 : vector<16x1024xf32>
    %43 = math.floor %42 : vector<16x1024xf32>
    %cst_19 = arith.constant 1.000000e+00 : f32
    %44 = vector.broadcast %cst_19 : f32 to vector<16x1024xf32>
    %45 = arith.mulf %44, %43 : vector<16x1024xf32>
    %46 = arith.subf %38, %45 : vector<16x1024xf32>
    %47 = arith.mulf %46, %46 : vector<16x1024xf32>
    %48 = arith.addf %33, %47 : vector<16x1024xf32>
    %49 = tpu.iota {dimensions = array<i32: 1>} : vector<16x1024xi32>
    %c1024_i32 = arith.constant 1024 : i32
    %50 = arith.muli %arg1, %c1024_i32 : i32
    %51 = vector.broadcast %50 : i32 to vector<16x1024xi32>
    %52 = arith.addi %49, %51 : vector<16x1024xi32>
    %53 = tpu.iota {dimensions = array<i32: 0>} : vector<16x1xi32>
    %c16_i32 = arith.constant 16 : i32
    %54 = arith.muli %arg0, %c16_i32 : i32
    %55 = vector.broadcast %54 : i32 to vector<16x1xi32>
    %56 = arith.addi %53, %55 : vector<16x1xi32>
    %57 = tpu.bitcast %48 : vector<16x1024xf32> -> vector<16x1024xi32>
    %c-2048_i32 = arith.constant -2048 : i32
    %58 = vector.broadcast %c-2048_i32 : i32 to vector<16x1024xi32>
    %59 = arith.andi %57, %58 : vector<16x1024xi32>
    %60 = arith.ori %59, %52 : vector<16x1024xi32>
    %61 = tpu.bitcast %60 : vector<16x1024xi32> -> vector<16x1024xf32>
    %62 = vector.broadcast %56 : vector<16x1xi32> to vector<16x1024xi32>
    %63 = arith.cmpi eq, %52, %62 : vector<16x1024xi32>
    %c1500_i32 = arith.constant 1500 : i32
    %64 = vector.broadcast %c1500_i32 : i32 to vector<16x1024xi32>
    %65 = arith.cmpi sge, %52, %64 : vector<16x1024xi32>
    %66 = arith.ori %63, %65 : vector<16x1024xi1>
    %cst_20 = arith.constant 3.000000e+38 : f32
    %67 = vector.broadcast %cst_20 : f32 to vector<16x1024xf32>
    %68 = arith.select %66, %67, %61 : vector<16x1024xi1>, vector<16x1024xf32>
    %c0_21 = arith.constant 0 : index
    %c0_22 = arith.constant 0 : index
    %69 = vector.load %arg5[%c0_21, %c0_22] : memref<16x128xf32, #tpu.memory_space<vmem>>, vector<16x128xf32>
    %70 = tpu.concatenate %68, %69 in 1 : vector<16x1024xf32>, vector<16x128xf32> -> vector<16x1152xf32>
    %71 = tpu.iota {dimensions = array<i32: 1>} : vector<16x128xi32>
    %cst_23 = arith.constant 3.000000e+38 : f32
    %72 = vector.broadcast %cst_23 : f32 to vector<16x128xf32>
    %cst_24 = arith.constant dense<0x7F800000> : vector<16xf32>
    %73 = vector.multi_reduction <minimumf>, %70, %cst_24 [1] : vector<16x1152xf32> to vector<16xf32>
    %74 = vector.shape_cast %73 : vector<16xf32> to vector<16x1xf32>
    %c0_i32_25 = arith.constant 0 : i32
    %75 = vector.broadcast %c0_i32_25 : i32 to vector<16x128xi32>
    %76 = arith.cmpi eq, %71, %75 : vector<16x128xi32>
    %77 = vector.shape_cast %74 : vector<16x1xf32> to vector<16x1xf32>
    %78 = vector.broadcast %77 : vector<16x1xf32> to vector<16x128xf32>
    %79 = arith.select %76, %78, %72 : vector<16x128xi1>, vector<16x128xf32>
    %80 = vector.broadcast %74 : vector<16x1xf32> to vector<16x1152xf32>
    %81 = arith.cmpf oeq, %70, %80 : vector<16x1152xf32>
    %cst_26 = arith.constant 3.000000e+38 : f32
    %82 = vector.broadcast %cst_26 : f32 to vector<16x1152xf32>
    %83 = arith.select %81, %82, %70 : vector<16x1152xi1>, vector<16x1152xf32>
    %cst_27 = arith.constant dense<0x7F800000> : vector<16xf32>
    %84 = vector.multi_reduction <minimumf>, %83, %cst_27 [1] : vector<16x1152xf32> to vector<16xf32>
    %85 = vector.shape_cast %84 : vector<16xf32> to vector<16x1xf32>
    %c1_i32 = arith.constant 1 : i32
    %86 = vector.broadcast %c1_i32 : i32 to vector<16x128xi32>
    %87 = arith.cmpi eq, %71, %86 : vector<16x128xi32>
    %88 = vector.shape_cast %85 : vector<16x1xf32> to vector<16x1xf32>
    %89 = vector.broadcast %88 : vector<16x1xf32> to vector<16x128xf32>
    %90 = arith.select %87, %89, %79 : vector<16x128xi1>, vector<16x128xf32>
    %91 = vector.broadcast %85 : vector<16x1xf32> to vector<16x1152xf32>
    %92 = arith.cmpf oeq, %83, %91 : vector<16x1152xf32>
    %cst_28 = arith.constant 3.000000e+38 : f32
    %93 = vector.broadcast %cst_28 : f32 to vector<16x1152xf32>
    %94 = arith.select %92, %93, %83 : vector<16x1152xi1>, vector<16x1152xf32>
    %cst_29 = arith.constant dense<0x7F800000> : vector<16xf32>
    %95 = vector.multi_reduction <minimumf>, %94, %cst_29 [1] : vector<16x1152xf32> to vector<16xf32>
    %96 = vector.shape_cast %95 : vector<16xf32> to vector<16x1xf32>
    %c2_i32 = arith.constant 2 : i32
    %97 = vector.broadcast %c2_i32 : i32 to vector<16x128xi32>
    %98 = arith.cmpi eq, %71, %97 : vector<16x128xi32>
    %99 = vector.shape_cast %96 : vector<16x1xf32> to vector<16x1xf32>
    %100 = vector.broadcast %99 : vector<16x1xf32> to vector<16x128xf32>
    %101 = arith.select %98, %100, %90 : vector<16x128xi1>, vector<16x128xf32>
    %102 = vector.broadcast %96 : vector<16x1xf32> to vector<16x1152xf32>
    %103 = arith.cmpf oeq, %94, %102 : vector<16x1152xf32>
    %cst_30 = arith.constant 3.000000e+38 : f32
    %104 = vector.broadcast %cst_30 : f32 to vector<16x1152xf32>
    %105 = arith.select %103, %104, %94 : vector<16x1152xi1>, vector<16x1152xf32>
    %cst_31 = arith.constant dense<0x7F800000> : vector<16xf32>
    %106 = vector.multi_reduction <minimumf>, %105, %cst_31 [1] : vector<16x1152xf32> to vector<16xf32>
    %107 = vector.shape_cast %106 : vector<16xf32> to vector<16x1xf32>
    %c3_i32 = arith.constant 3 : i32
    %108 = vector.broadcast %c3_i32 : i32 to vector<16x128xi32>
    %109 = arith.cmpi eq, %71, %108 : vector<16x128xi32>
    %110 = vector.shape_cast %107 : vector<16x1xf32> to vector<16x1xf32>
    %111 = vector.broadcast %110 : vector<16x1xf32> to vector<16x128xf32>
    %112 = arith.select %109, %111, %101 : vector<16x128xi1>, vector<16x128xf32>
    %113 = vector.broadcast %107 : vector<16x1xf32> to vector<16x1152xf32>
    %114 = arith.cmpf oeq, %105, %113 : vector<16x1152xf32>
    %cst_32 = arith.constant 3.000000e+38 : f32
    %115 = vector.broadcast %cst_32 : f32 to vector<16x1152xf32>
    %116 = arith.select %114, %115, %105 : vector<16x1152xi1>, vector<16x1152xf32>
    %cst_33 = arith.constant dense<0x7F800000> : vector<16xf32>
    %117 = vector.multi_reduction <minimumf>, %116, %cst_33 [1] : vector<16x1152xf32> to vector<16xf32>
    %118 = vector.shape_cast %117 : vector<16xf32> to vector<16x1xf32>
    %c4_i32 = arith.constant 4 : i32
    %119 = vector.broadcast %c4_i32 : i32 to vector<16x128xi32>
    %120 = arith.cmpi eq, %71, %119 : vector<16x128xi32>
    %121 = vector.shape_cast %118 : vector<16x1xf32> to vector<16x1xf32>
    %122 = vector.broadcast %121 : vector<16x1xf32> to vector<16x128xf32>
    %123 = arith.select %120, %122, %112 : vector<16x128xi1>, vector<16x128xf32>
    %124 = vector.broadcast %118 : vector<16x1xf32> to vector<16x1152xf32>
    %125 = arith.cmpf oeq, %116, %124 : vector<16x1152xf32>
    %cst_34 = arith.constant 3.000000e+38 : f32
    %126 = vector.broadcast %cst_34 : f32 to vector<16x1152xf32>
    %127 = arith.select %125, %126, %116 : vector<16x1152xi1>, vector<16x1152xf32>
    %cst_35 = arith.constant dense<0x7F800000> : vector<16xf32>
    %128 = vector.multi_reduction <minimumf>, %127, %cst_35 [1] : vector<16x1152xf32> to vector<16xf32>
    %129 = vector.shape_cast %128 : vector<16xf32> to vector<16x1xf32>
    %c5_i32 = arith.constant 5 : i32
    %130 = vector.broadcast %c5_i32 : i32 to vector<16x128xi32>
    %131 = arith.cmpi eq, %71, %130 : vector<16x128xi32>
    %132 = vector.shape_cast %129 : vector<16x1xf32> to vector<16x1xf32>
    %133 = vector.broadcast %132 : vector<16x1xf32> to vector<16x128xf32>
    %134 = arith.select %131, %133, %123 : vector<16x128xi1>, vector<16x128xf32>
    %135 = vector.broadcast %129 : vector<16x1xf32> to vector<16x1152xf32>
    %136 = arith.cmpf oeq, %127, %135 : vector<16x1152xf32>
    %cst_36 = arith.constant 3.000000e+38 : f32
    %137 = vector.broadcast %cst_36 : f32 to vector<16x1152xf32>
    %138 = arith.select %136, %137, %127 : vector<16x1152xi1>, vector<16x1152xf32>
    %cst_37 = arith.constant dense<0x7F800000> : vector<16xf32>
    %139 = vector.multi_reduction <minimumf>, %138, %cst_37 [1] : vector<16x1152xf32> to vector<16xf32>
    %140 = vector.shape_cast %139 : vector<16xf32> to vector<16x1xf32>
    %c6_i32 = arith.constant 6 : i32
    %141 = vector.broadcast %c6_i32 : i32 to vector<16x128xi32>
    %142 = arith.cmpi eq, %71, %141 : vector<16x128xi32>
    %143 = vector.shape_cast %140 : vector<16x1xf32> to vector<16x1xf32>
    %144 = vector.broadcast %143 : vector<16x1xf32> to vector<16x128xf32>
    %145 = arith.select %142, %144, %134 : vector<16x128xi1>, vector<16x128xf32>
    %146 = vector.broadcast %140 : vector<16x1xf32> to vector<16x1152xf32>
    %147 = arith.cmpf oeq, %138, %146 : vector<16x1152xf32>
    %cst_38 = arith.constant 3.000000e+38 : f32
    %148 = vector.broadcast %cst_38 : f32 to vector<16x1152xf32>
    %149 = arith.select %147, %148, %138 : vector<16x1152xi1>, vector<16x1152xf32>
    %cst_39 = arith.constant dense<0x7F800000> : vector<16xf32>
    %150 = vector.multi_reduction <minimumf>, %149, %cst_39 [1] : vector<16x1152xf32> to vector<16xf32>
    %151 = vector.shape_cast %150 : vector<16xf32> to vector<16x1xf32>
    %c7_i32 = arith.constant 7 : i32
    %152 = vector.broadcast %c7_i32 : i32 to vector<16x128xi32>
    %153 = arith.cmpi eq, %71, %152 : vector<16x128xi32>
    %154 = vector.shape_cast %151 : vector<16x1xf32> to vector<16x1xf32>
    %155 = vector.broadcast %154 : vector<16x1xf32> to vector<16x128xf32>
    %156 = arith.select %153, %155, %145 : vector<16x128xi1>, vector<16x128xf32>
    %157 = vector.broadcast %151 : vector<16x1xf32> to vector<16x1152xf32>
    %158 = arith.cmpf oeq, %149, %157 : vector<16x1152xf32>
    %cst_40 = arith.constant 3.000000e+38 : f32
    %159 = vector.broadcast %cst_40 : f32 to vector<16x1152xf32>
    %160 = arith.select %158, %159, %149 : vector<16x1152xi1>, vector<16x1152xf32>
    %cst_41 = arith.constant dense<0x7F800000> : vector<16xf32>
    %161 = vector.multi_reduction <minimumf>, %160, %cst_41 [1] : vector<16x1152xf32> to vector<16xf32>
    %162 = vector.shape_cast %161 : vector<16xf32> to vector<16x1xf32>
    %c8_i32 = arith.constant 8 : i32
    %163 = vector.broadcast %c8_i32 : i32 to vector<16x128xi32>
    %164 = arith.cmpi eq, %71, %163 : vector<16x128xi32>
    %165 = vector.shape_cast %162 : vector<16x1xf32> to vector<16x1xf32>
    %166 = vector.broadcast %165 : vector<16x1xf32> to vector<16x128xf32>
    %167 = arith.select %164, %166, %156 : vector<16x128xi1>, vector<16x128xf32>
    %168 = vector.broadcast %162 : vector<16x1xf32> to vector<16x1152xf32>
    %169 = arith.cmpf oeq, %160, %168 : vector<16x1152xf32>
    %cst_42 = arith.constant 3.000000e+38 : f32
    %170 = vector.broadcast %cst_42 : f32 to vector<16x1152xf32>
    %171 = arith.select %169, %170, %160 : vector<16x1152xi1>, vector<16x1152xf32>
    %cst_43 = arith.constant dense<0x7F800000> : vector<16xf32>
    %172 = vector.multi_reduction <minimumf>, %171, %cst_43 [1] : vector<16x1152xf32> to vector<16xf32>
    %173 = vector.shape_cast %172 : vector<16xf32> to vector<16x1xf32>
    %c9_i32 = arith.constant 9 : i32
    %174 = vector.broadcast %c9_i32 : i32 to vector<16x128xi32>
    %175 = arith.cmpi eq, %71, %174 : vector<16x128xi32>
    %176 = vector.shape_cast %173 : vector<16x1xf32> to vector<16x1xf32>
    %177 = vector.broadcast %176 : vector<16x1xf32> to vector<16x128xf32>
    %178 = arith.select %175, %177, %167 : vector<16x128xi1>, vector<16x128xf32>
    %179 = vector.broadcast %173 : vector<16x1xf32> to vector<16x1152xf32>
    %180 = arith.cmpf oeq, %171, %179 : vector<16x1152xf32>
    %cst_44 = arith.constant 3.000000e+38 : f32
    %181 = vector.broadcast %cst_44 : f32 to vector<16x1152xf32>
    %182 = arith.select %180, %181, %171 : vector<16x1152xi1>, vector<16x1152xf32>
    %cst_45 = arith.constant dense<0x7F800000> : vector<16xf32>
    %183 = vector.multi_reduction <minimumf>, %182, %cst_45 [1] : vector<16x1152xf32> to vector<16xf32>
    %184 = vector.shape_cast %183 : vector<16xf32> to vector<16x1xf32>
    %c10_i32 = arith.constant 10 : i32
    %185 = vector.broadcast %c10_i32 : i32 to vector<16x128xi32>
    %186 = arith.cmpi eq, %71, %185 : vector<16x128xi32>
    %187 = vector.shape_cast %184 : vector<16x1xf32> to vector<16x1xf32>
    %188 = vector.broadcast %187 : vector<16x1xf32> to vector<16x128xf32>
    %189 = arith.select %186, %188, %178 : vector<16x128xi1>, vector<16x128xf32>
    %190 = vector.broadcast %184 : vector<16x1xf32> to vector<16x1152xf32>
    %191 = arith.cmpf oeq, %182, %190 : vector<16x1152xf32>
    %cst_46 = arith.constant 3.000000e+38 : f32
    %192 = vector.broadcast %cst_46 : f32 to vector<16x1152xf32>
    %193 = arith.select %191, %192, %182 : vector<16x1152xi1>, vector<16x1152xf32>
    %cst_47 = arith.constant dense<0x7F800000> : vector<16xf32>
    %194 = vector.multi_reduction <minimumf>, %193, %cst_47 [1] : vector<16x1152xf32> to vector<16xf32>
    %195 = vector.shape_cast %194 : vector<16xf32> to vector<16x1xf32>
    %c11_i32 = arith.constant 11 : i32
    %196 = vector.broadcast %c11_i32 : i32 to vector<16x128xi32>
    %197 = arith.cmpi eq, %71, %196 : vector<16x128xi32>
    %198 = vector.shape_cast %195 : vector<16x1xf32> to vector<16x1xf32>
    %199 = vector.broadcast %198 : vector<16x1xf32> to vector<16x128xf32>
    %200 = arith.select %197, %199, %189 : vector<16x128xi1>, vector<16x128xf32>
    %201 = vector.broadcast %195 : vector<16x1xf32> to vector<16x1152xf32>
    %202 = arith.cmpf oeq, %193, %201 : vector<16x1152xf32>
    %cst_48 = arith.constant 3.000000e+38 : f32
    %203 = vector.broadcast %cst_48 : f32 to vector<16x1152xf32>
    %204 = arith.select %202, %203, %193 : vector<16x1152xi1>, vector<16x1152xf32>
    %cst_49 = arith.constant dense<0x7F800000> : vector<16xf32>
    %205 = vector.multi_reduction <minimumf>, %204, %cst_49 [1] : vector<16x1152xf32> to vector<16xf32>
    %206 = vector.shape_cast %205 : vector<16xf32> to vector<16x1xf32>
    %c12_i32 = arith.constant 12 : i32
    %207 = vector.broadcast %c12_i32 : i32 to vector<16x128xi32>
    %208 = arith.cmpi eq, %71, %207 : vector<16x128xi32>
    %209 = vector.shape_cast %206 : vector<16x1xf32> to vector<16x1xf32>
    %210 = vector.broadcast %209 : vector<16x1xf32> to vector<16x128xf32>
    %211 = arith.select %208, %210, %200 : vector<16x128xi1>, vector<16x128xf32>
    %212 = vector.broadcast %206 : vector<16x1xf32> to vector<16x1152xf32>
    %213 = arith.cmpf oeq, %204, %212 : vector<16x1152xf32>
    %cst_50 = arith.constant 3.000000e+38 : f32
    %214 = vector.broadcast %cst_50 : f32 to vector<16x1152xf32>
    %215 = arith.select %213, %214, %204 : vector<16x1152xi1>, vector<16x1152xf32>
    %cst_51 = arith.constant dense<0x7F800000> : vector<16xf32>
    %216 = vector.multi_reduction <minimumf>, %215, %cst_51 [1] : vector<16x1152xf32> to vector<16xf32>
    %217 = vector.shape_cast %216 : vector<16xf32> to vector<16x1xf32>
    %c13_i32 = arith.constant 13 : i32
    %218 = vector.broadcast %c13_i32 : i32 to vector<16x128xi32>
    %219 = arith.cmpi eq, %71, %218 : vector<16x128xi32>
    %220 = vector.shape_cast %217 : vector<16x1xf32> to vector<16x1xf32>
    %221 = vector.broadcast %220 : vector<16x1xf32> to vector<16x128xf32>
    %222 = arith.select %219, %221, %211 : vector<16x128xi1>, vector<16x128xf32>
    %223 = vector.broadcast %217 : vector<16x1xf32> to vector<16x1152xf32>
    %224 = arith.cmpf oeq, %215, %223 : vector<16x1152xf32>
    %cst_52 = arith.constant 3.000000e+38 : f32
    %225 = vector.broadcast %cst_52 : f32 to vector<16x1152xf32>
    %226 = arith.select %224, %225, %215 : vector<16x1152xi1>, vector<16x1152xf32>
    %cst_53 = arith.constant dense<0x7F800000> : vector<16xf32>
    %227 = vector.multi_reduction <minimumf>, %226, %cst_53 [1] : vector<16x1152xf32> to vector<16xf32>
    %228 = vector.shape_cast %227 : vector<16xf32> to vector<16x1xf32>
    %c14_i32 = arith.constant 14 : i32
    %229 = vector.broadcast %c14_i32 : i32 to vector<16x128xi32>
    %230 = arith.cmpi eq, %71, %229 : vector<16x128xi32>
    %231 = vector.shape_cast %228 : vector<16x1xf32> to vector<16x1xf32>
    %232 = vector.broadcast %231 : vector<16x1xf32> to vector<16x128xf32>
    %233 = arith.select %230, %232, %222 : vector<16x128xi1>, vector<16x128xf32>
    %234 = vector.broadcast %228 : vector<16x1xf32> to vector<16x1152xf32>
    %235 = arith.cmpf oeq, %226, %234 : vector<16x1152xf32>
    %cst_54 = arith.constant 3.000000e+38 : f32
    %236 = vector.broadcast %cst_54 : f32 to vector<16x1152xf32>
    %237 = arith.select %235, %236, %226 : vector<16x1152xi1>, vector<16x1152xf32>
    %cst_55 = arith.constant dense<0x7F800000> : vector<16xf32>
    %238 = vector.multi_reduction <minimumf>, %237, %cst_55 [1] : vector<16x1152xf32> to vector<16xf32>
    %239 = vector.shape_cast %238 : vector<16xf32> to vector<16x1xf32>
    %c15_i32 = arith.constant 15 : i32
    %240 = vector.broadcast %c15_i32 : i32 to vector<16x128xi32>
    %241 = arith.cmpi eq, %71, %240 : vector<16x128xi32>
    %242 = vector.shape_cast %239 : vector<16x1xf32> to vector<16x1xf32>
    %243 = vector.broadcast %242 : vector<16x1xf32> to vector<16x128xf32>
    %244 = arith.select %241, %243, %233 : vector<16x128xi1>, vector<16x128xf32>
    %245 = vector.broadcast %239 : vector<16x1xf32> to vector<16x1152xf32>
    %246 = arith.cmpf oeq, %237, %245 : vector<16x1152xf32>
    %cst_56 = arith.constant 3.000000e+38 : f32
    %247 = vector.broadcast %cst_56 : f32 to vector<16x1152xf32>
    %248 = arith.select %246, %247, %237 : vector<16x1152xi1>, vector<16x1152xf32>
    %cst_57 = arith.constant dense<0x7F800000> : vector<16xf32>
    %249 = vector.multi_reduction <minimumf>, %248, %cst_57 [1] : vector<16x1152xf32> to vector<16xf32>
    %250 = vector.shape_cast %249 : vector<16xf32> to vector<16x1xf32>
    %c16_i32_58 = arith.constant 16 : i32
    %251 = vector.broadcast %c16_i32_58 : i32 to vector<16x128xi32>
    %252 = arith.cmpi eq, %71, %251 : vector<16x128xi32>
    %253 = vector.shape_cast %250 : vector<16x1xf32> to vector<16x1xf32>
    %254 = vector.broadcast %253 : vector<16x1xf32> to vector<16x128xf32>
    %255 = arith.select %252, %254, %244 : vector<16x128xi1>, vector<16x128xf32>
    %c0_59 = arith.constant 0 : index
    %c0_60 = arith.constant 0 : index
    %256 = vector.load %arg5[%c0_59, %c0_60] : memref<16x128xf32, #tpu.memory_space<vmem>>, vector<16x128xf32>
    tpu.vector_store %arg5[%c0_59, %c0_60], %255 {strides = array<i32>} : memref<16x128xf32, #tpu.memory_space<vmem>>, vector<16x128xf32>,
    %c1_i32_61 = arith.constant 1 : i32
    %257 = arith.cmpi eq, %arg1, %c1_i32_61 : i32
    %258 = arith.extui %257 : i1 to i32
    %c0_i32_62 = arith.constant 0 : i32
    %259 = arith.cmpi ne, %258, %c0_i32_62 : i32
    scf.if %259 {
      %260 = tpu.bitcast %255 : vector<16x128xf32> -> vector<16x128xi32>
      %c2047_i32 = arith.constant 2047 : i32
      %261 = vector.broadcast %c2047_i32 : i32 to vector<16x128xi32>
      %262 = arith.andi %260, %261 : vector<16x128xi32>
      %c0_63 = arith.constant 0 : index
      %c0_64 = arith.constant 0 : index
      %263 = vector.load %arg4[%c0_63, %c0_64] : memref<16x128xi32, #tpu.memory_space<vmem>>, vector<16x128xi32>
      tpu.vector_store %arg4[%c0_63, %c0_64], %262 {strides = array<i32>} : memref<16x128xi32, #tpu.memory_space<vmem>>, vector<16x128xi32>,
    } else {
    }
    return
  }
  func.func @transform_0(%arg0: i32, %arg1: i32) -> (i32, i32) {
    %c0_i32 = arith.constant 0 : i32
    %c0_i32_0 = arith.constant 0 : i32
    return %arg0, %c0_i32 : i32, i32
  }
  func.func @transform_1(%arg0: i32, %arg1: i32) -> (i32, i32) {
    %c0_i32 = arith.constant 0 : i32
    %c0_i32_0 = arith.constant 0 : i32
    return %c0_i32, %arg1 : i32, i32
  }
  func.func @transform_2(%arg0: i32, %arg1: i32) -> (i32, i32) {
    %c0_i32 = arith.constant 0 : i32
    %c0_i32_0 = arith.constant 0 : i32
    return %arg0, %c0_i32 : i32, i32
  }
}

</mosaic_0001>

<bundles_post_ra>
// kernel: tpu_custom_call.1
= control target key start
LH: loop header
LB: loop body
LE: loop exit
PB: predicated region body
PF: predicated region fallthrough
CT: control target
= control target key end

     0   :  { %7 = vsyncpa [#allocation4], 0  ;;  %s3233_s0 = inlined_call_operand.vmem [shape: f32[1504,8], index: 0, kind: input, shape index: {}]   ;;  %s3234_s1 = inlined_call_operand.vmem [shape: f32[8,2048], index: 1, kind: input, shape index: {}]   ;;  %s3235_s2 = inlined_call_operand.hbm [shape: s32[1504,128], index: 2, kind: output, shape index: {}]  }
   0x1   :  { %9 = vsyncpa [#allocation4 + $0x1], 0  ;;  %s2082_s9 = smov 0   ;;  %s2084_s10 = smov 0  }
   0x2   :  { %s2086_s11 = smov 0   ;;  %s2088_s12 = smov 0  }
   0x3   :  { %s2090_s13 = smov 0   ;;  %s2092_s14 = smov 0  }
   0x4   :  { %s2094_s15 = smov 0   ;;  %s2096_s16 = smov 0  }
   0x5 LB: > { %s1861_s17 = sadd.s32 4294967295, %s2058_s16   ;;  %s1862_s18 = sadd.s32 4294967294, %s2058_s16   ;;  %s2058_s16 = sphi %s2096_s16, %s15_s16   ;;  %s2054_s15 = sphi %s2094_s15, %s3345_s15   ;;  %s2050_s14 = sphi %s2092_s14, %s3344_s14   ;;  %s2046_s13 = sphi %s2090_s13, %s3343_s13   ;;  %s2042_s12 = sphi %s2088_s12, %s3342_s12   ;;  %s2038_s11 = sphi %s2086_s11, %s3341_s11   ;;  %s2034_s10 = sphi %s2084_s10, %s3340_s10   ;;  %s2030_s9 = sphi %s2082_s9, %s3339_s9  }
   0x6   : > { %s24_s19 = sadd.s32 1, %s2050_s14  ;;  %s27_s20 = sadd.s32 1, %s2054_s15 }
   0x7   : > { %p25_p0 = scmp.ge.s32.totalorder %s24_s19, 2  ;;  %p96_p1 = scmp.ne.s32.totalorder %s2038_s11, %s2034_s10 }
   0x8   : > { %p97_p2 = scmp.eq.s32.totalorder %s1861_s17, 187  ;;  %p102_p4 = scmp.ne.s32.totalorder %s2034_s10, %s2030_s9 }
   0x9   : > { %s3347_s19 = smov (%p25_p0, %s24_s19), 0  ;;  %s3349_s20 = smov (!%p25_p0, %s27_s20), %s2054_s15 }
   0xa   : > { %p2131_p3 = por %p97_p2, %p96_p1  ;;  %p29_p5 = scmp.ge.s32.totalorder %s3349_s20, 94 }
   0xb   : > { %p103_p6 = scmp.eq.s32.totalorder %s1862_s18, 187  ;;  %p1865_p7 = scmp.ge.s32.totalorder %s2058_s16, 1 }
   0xc   : > { %p139_p8 = scmp.lt.s32.totalorder %s2058_s16, 189  ;;  %s3351_s20 = smov (%p29_p5, %s3349_s20), 0 }
   0xd   : > { %p2141_p9 = por %p103_p6, %p102_p4  ;;  %s83_s23 = ssub.s32 %s2054_s15, %s3351_s20 }
   0xe   : > { %p140_p10 = pnand %p1865_p7, %p139_p8  ;;  %s86_s24 = sadd.s32 1, %s2038_s11 }
   0xf   : > { %p84_p11 = scmp.eq.s32.totalorder %s83_s23, 0 }
  0x10   : > { %143 = sbr.rel (%p140_p10) target bundleno = 2837 (0xb15), region = 28 }
  0x11   : > { %s2149_s25 = scalar_select %p84_p11, %s2038_s11, %s86_s24  }
  0x15   : > { %s163_s26 = sand.u32 1, %s2034_s10   ;;  %s1867_s27 = sshll.u32 %s2046_s13, 1 }
  0x16   : > { %s1866_s28 = sshll.u32 %s163_s26, 4  ;;  %p167_p12 = scmp.lt.s32.totalorder %s1867_s27, 187 }
  0x17   : > { %s1869_s29 = sshll.u32 %s2042_s12, 3  ;;  %s2164_s18 = scalar_lea.vmem [#allocation3], %s1866_s28 }
  0x18   : > { %s3353_s27 = smov (!%p167_p12, %s1867_s27), 187  ;;  %p173_p13 = scmp.lt.s32.totalorder %s1869_s29, 15 }
  0x19   : > { %s1868_s30 = sshll.u32 %s3353_s27, 3  ;;  %p1871_p0 = scmp.ne.s32.totalorder %s2042_s12, 0 }
  0x1a   : > { %s170_s5 = scalar_lea.vmem %s3233_s0, %s1868_s30  ;;  %s3355_s29 = smov (!%p173_p13, %s1869_s29), 15 }
  0x1b   : > { %s1870_s6 = sshll.u32 %s3355_s29, 3  ;;  %182 = sbr.rel (%p1871_p0) target bundleno = 34 (0x22), region = 32 }
  0x1c   : > { %s2162_s17 = scalar_lea.vmem %s3234_s1, %s1870_s6 }
  0x20   : > { %v2060_v0 = vmov 3e+38  }
  0x21   : > { %183 = vst [vmem:[#allocation2] sm:$0xff] %v2060_v0  ;;  %184 = vst [vmem:[#allocation2 + $0x8] sm:$0xff] %v2060_v0 }
  0x22 PF: > { %v185_v1 = vld [vmem:[%s170_s5] sm:$0xff]  ;;  %v2061_v2 = vmov 1   ;;  %v2062_v3 = vmov 0   ;;  %v186_v4 = vld [vmem:[%s170_s5 + $0x8] sm:$0xff]  ;;  %v2063_v5 = vmov 2   ;;  %v201_v6 = vlaneseq  ;;  %s1876_s23 = sshll.u32 %s2042_s12, 10 }
  0x23   : > { %1963 = vset.pattern.permute.xlu1 %v2061_v2  ;;  %1962 = vset.pattern.permute.xlu0 %v2062_v3  ;;  %v1872_v8 = vld [vmem:[%s2162_s17 + $0x1] ss:$8 sm:$0xf]  ;;  %v187_v10 = vld [vmem:[%s2162_s17] ss:$8 sm:$0xf]  ;;  %v645_v49 = vstv %s1876_s23 }
  0x24   : > { %342 = vperm.xlu1 %1963, %v185_v1   ;;  %192 = vperm.xlu0 %1962, %v185_v1   ;;  %v2167_v7 = vshrl.u32 %v201_v6, 7  ;;  %v1873_v9 = vld [vmem:[%s2162_s17 + $0x1] ss:$8 sm:$0xf0]  ;;  %v2182_v23 = vand.u32 127, %v201_v6  ;;  %s1877_s24 = sshll.u32 %s2046_s13, 4 }
  0x25   : > { %v188_v11 = vld [vmem:[%s2162_s17] ss:$8 sm:$0xf0]  ;;  %v340_v16 = vor.u32 %v1873_v9, %v1872_v8  ;;  %v1874_v17 = vld [vmem:[%s2162_s17 + $0x2] ss:$8 sm:$0xf]  ;;  %v658_v57 = vstv %s1877_s24 }
  0x26   : > { %v203_v12 = vsub.s32 0, %v2167_v7  ;;  %v207_v13 = vsub.s32 1, %v2167_v7  ;;  %v211_v14 = vsub.s32 2, %v2167_v7  ;;  %v215_v15 = vsub.s32 3, %v2167_v7  ;;  %3267 = vst [vmem:[#allocation6_spill] sm:$0xff] %v2182_v23  ;;  %p1878_p1 = scmp.ne.s32.totalorder %s2042_s12, 1 }
  0x27   : > { %v1875_v18 = vld [vmem:[%s2162_s17 + $0x2] ss:$8 sm:$0xf0]  ;;  %v219_v19 = vsub.s32 4, %v2167_v7  ;;  %v189_v20 = vor.u32 %v188_v11, %v187_v10  ;;  %v223_v21 = vsub.s32 5, %v2167_v7  ;;  %v227_v22 = vsub.s32 6, %v2167_v7 }
  0x28   : > { %346 = vperm.xlu1 %1963, %v186_v4   ;;  %197 = vperm.xlu0 %1962, %v186_v4   ;;  %v489_v24 = vor.u32 %v1875_v18, %v1874_v17  ;;  %v231_v25 = vsub.s32 7, %v2167_v7  ;;  %v2185_v26 = vrot.slane %v340_v16, %v203_v12  ;;  %v2187_v27 = vrot.slane %v340_v16, %v207_v13 }
  0x29   : > { %v2189_v28 = vrot.slane %v340_v16, %v211_v14  ;;  %v2191_v29 = vrot.slane %v340_v16, %v215_v15  ;;  %v2193_v30 = vrot.slane %v340_v16, %v219_v19  ;;  %v2195_v31 = vrot.slane %v189_v20, %v203_v12 }
  0x2a   : > { %v2197_v32 = vrot.slane %v189_v20, %v207_v13  ;;  %v2199_v33 = vrot.slane %v189_v20, %v211_v14  ;;  %v2201_v34 = vrot.slane %v189_v20, %v215_v15  ;;  %v2203_v35 = vrot.slane %v189_v20, %v219_v19 }
  0x2b   : > { %v2205_v36 = vrot.slane %v189_v20, %v223_v21  ;;  %v2207_v37 = vrot.slane %v189_v20, %v227_v22  ;;  %v2210_v38 = vrot.slane %v489_v24, %v203_v12  ;;  %v2212_v39 = vrot.slane %v489_v24, %v211_v14 }
  0x2c   : > { %1965 = vset.pattern.permute.xlu1 %v2063_v5  ;;  %1964 = vset.pattern.permute.xlu0 %v2063_v5  ;;  %v2214_v40 = vrot.slane %v189_v20, %v231_v25  ;;  %v2216_v41 = vrot.slane %v340_v16, %v223_v21  ;;  %v2218_v42 = vrot.slane %v340_v16, %v227_v22  ;;  %v637_v44 = vadd.s32 128, %v2182_v23 }
  0x2d   : > { %495 = vperm.xlu1 %1965, %v186_v4   ;;  %491 = vperm.xlu0 %1964, %v185_v1   ;;  %v2220_v43 = vrot.slane %v340_v16, %v231_v25  ;;  %v638_v45 = vadd.s32 256, %v2182_v23  ;;  %v639_v46 = vadd.s32 384, %v2182_v23  ;;  %v640_v47 = vadd.s32 512, %v2182_v23 }
  0x2e   : > { %v641_v48 = vadd.s32 640, %v2182_v23  ;;  %v2228_v50 = vrot.slane %v489_v24, %v207_v13  ;;  %v642_v51 = vadd.s32 768, %v2182_v23  ;;  %v643_v52 = vadd.s32 896, %v2182_v23 }
  0x2f   : > { %v656_v53 = vadd.s32 8, %v2167_v7  ;;  %v2233_v54 = vrot.slane %v489_v24, %v215_v15  ;;  %v2235_v55 = vrot.slane %v489_v24, %v219_v19  ;;  %v2237_v56 = vrot.slane %v489_v24, %v223_v21 }
  0x30   : > { %v2239_v58 = vrot.slane %v489_v24, %v227_v22  ;;  %v2241_v59 = vrot.slane %v489_v24, %v231_v25  ;;  %v2244_v60 = vadd.s32 %v645_v49, %v2182_v23  ;;  %v2246_v61 = vadd.s32 %v645_v49, %v637_v44 }
  0x31   : > { %v2248_v62 = vadd.s32 %v645_v49, %v638_v45  ;;  %v2250_v63 = vadd.s32 %v645_v49, %v639_v46  ;;  %v2252_v0 = vadd.s32 %v645_v49, %v640_v47  ;;  %v2254_v1 = vadd.s32 %v645_v49, %v641_v48 }
  0x32   : > { %v2260_v4 = vadd.s32 %v645_v49, %v642_v51  ;;  %v2262_v5 = vadd.s32 %v645_v49, %v643_v52  ;;  %v2264_v6 = vadd.s32 %v658_v57, %v656_v53  ;;  %v2267_v8 = vadd.s32 %v658_v57, %v2167_v7 }
  0x33   : > { %vm741_vm1 = vcmp.ge.s32.totalorder %v2244_v60, 1500  ;;  %vm742_vm3 = vcmp.ge.s32.totalorder %v2246_v61, 1500  ;;  %vm743_vm5 = vcmp.ge.s32.totalorder %v2248_v62, 1500  ;;  %vm744_vm7 = vcmp.ge.s32.totalorder %v2250_v63, 1500 }
  0x34   : > { %3270 = vst [vmem:[#allocation9_spill] sm:$0xff] %v2267_v8  ;;  %vm733_vm0 = vcmp.eq.s32.totalorder %v2244_v60, %v2264_v6  ;;  %vm734_vm2 = vcmp.eq.s32.totalorder %v2246_v61, %v2264_v6  ;;  %vm735_vm4 = vcmp.eq.s32.totalorder %v2248_v62, %v2264_v6  ;;  %vm736_vm6 = vcmp.eq.s32.totalorder %v2250_v63, %v2264_v6 }
  0x35   : > { %vm737_vm8 = vcmp.eq.s32.totalorder %v2252_v0, %v2264_v6  ;;  %vm3263_vm9 = vcmp.ge.s32.totalorder %v2252_v0, 1500  ;;  %vm738_vm10 = vcmp.eq.s32.totalorder %v2254_v1, %v2264_v6  ;;  %vm3262_vm11 = vcmp.ge.s32.totalorder %v2254_v1, 1500  ;;  %vm2448_vm14 = vmor %vm733_vm0, %vm741_vm1 }
  0x36   : > { %vm739_vm12 = vcmp.eq.s32.totalorder %v2260_v4, %v2264_v6  ;;  %vm747_vm13 = vcmp.ge.s32.totalorder %v2260_v4, 1500  ;;  %vm2457_vm15 = vmor %vm734_vm2, %vm742_vm3 }
  0x37   : > { %vm2467_vm0 = vmor %vm735_vm4, %vm743_vm5 }
  0x38   : > { %vm2477_vm2 = vmor %vm736_vm6, %vm744_vm7 }
  0x39   : > { %vm2486_vm4 = vmor %vm737_vm8, %vm3263_vm9 }
  0x3a   : > { %vm2495_vm6 = vmor %vm738_vm10, %vm3262_vm11  ;;  %vm3302_vm10 = vcmp.ge.s32.totalorder %v2262_v5, 1500  ;;  %vm3303_vm11 = vcmp.eq.s32.totalorder %v2262_v5, %v2264_v6 }
  0x3b   : > { %vm763_vm8 = vmor %vm739_vm12, %vm747_vm13 }
  0x3c   : > { %vm764_vm9 = vmor %vm3303_vm11, %vm3302_vm10 }
  0x9f   : > { %v2256_v2 = vpop.permute.xlu1 %342  ;;  %v2258_v3 = vpop.permute.xlu0 %192 }
  0xa0   : > { %3268 = vst [vmem:[#allocation7_spill] sm:$0xff] %v2256_v2  ;;  %3269 = vst [vmem:[#allocation8_spill] sm:$0xff] %v2258_v3  ;;  %v2271_v9 = vsub.f32 %v2256_v2, %v2185_v26  ;;  %v2275_v10 = vsub.f32 %v2256_v2, %v2187_v27  ;;  %v2279_v11 = vsub.f32 %v2256_v2, %v2189_v28 }
  0xa1   : > { %v2283_v12 = vsub.f32 %v2256_v2, %v2191_v29  ;;  %v2287_v7 = vsub.f32 %v2256_v2, %v2193_v30  ;;  %v2291_v13 = vsub.f32 %v2258_v3, %v2195_v31  ;;  %v2295_v14 = vsub.f32 %v2258_v3, %v2197_v32 }
  0xa2   : > { %3271 = vst [vmem:[#allocation10_spill] sm:$0xff] %v2271_v9  ;;  %3272 = vst [vmem:[#allocation11_spill] sm:$0xff] %v2275_v10  ;;  %v2299_v15 = vsub.f32 %v2258_v3, %v2199_v33  ;;  %v2302_v16 = vadd.f32 0.5, %v2271_v9  ;;  %v2305_v17 = vadd.f32 0.5, %v2279_v11  ;;  %v2309_v18 = vsub.f32 %v2258_v3, %v2201_v34 }
  0xa3   : > { %3273 = vst [vmem:[#allocation12_spill] sm:$0xff] %v2279_v11  ;;  %3274 = vst [vmem:[#allocation13_spill] sm:$0xff] %v2283_v12  ;;  %v2313_v19 = vsub.f32 %v2258_v3, %v2203_v35  ;;  %v2316_v20 = vadd.f32 0.5, %v2291_v13  ;;  %v2321_v22 = vpop.permute.xlu1 %346  ;;  %v198_v24 = vpop.permute.xlu0 %197  ;;  %v2325_v25 = vsub.f32 %v2258_v3, %v2205_v36  ;;  %v2329_v44 = vsub.f32 %v2258_v3, %v2207_v37 }
  0xa4   : > { %3275 = vst [vmem:[#allocation14_spill] sm:$0xff] %v2287_v7  ;;  %3276 = vst [vmem:[#allocation15_spill] sm:$0xff] %v2291_v13  ;;  %v2319_v21 = vadd.f32 0.5, %v2299_v15  ;;  %v2335_v47 = vsub.f32 %v2321_v22, %v2185_v26  ;;  %v2339_v48 = vsub.f32 %v2321_v22, %v2187_v27  ;;  %v2345_v52 = vsub.f32 %v2321_v22, %v2189_v28 }
  0xa5   : > { %3277 = vst [vmem:[#allocation16_spill] sm:$0xff] %v2295_v14  ;;  %3278 = vst [vmem:[#allocation17_spill] sm:$0xff] %v2299_v15  ;;  %v2349_v53 = vsub.f32 %v2321_v22, %v2191_v29  ;;  %v2353_v26 = vsub.f32 %v2321_v22, %v2193_v30  ;;  %v249_v27 = vsub.f32 %v198_v24, %v2195_v31 }
  0xa6   : > { %3279 = vst [vmem:[#allocation18_spill] sm:$0xff] %v2302_v16  ;;  %3280 = vst [vmem:[#allocation19_spill] sm:$0xff] %v2305_v17  ;;  %v414_v57 = vadd.f32 0.5, %v2335_v47  ;;  %v250_v46 = vsub.f32 %v198_v24, %v2197_v32  ;;  %v416_v45 = vadd.f32 0.5, %v2345_v52  ;;  %v251_v51 = vsub.f32 %v198_v24, %v2199_v33 }
  0xa7   : > { %3281 = vst [vmem:[#allocation20_spill] sm:$0xff] %v2309_v18  ;;  %3282 = vst [vmem:[#allocation21_spill] sm:$0xff] %v2313_v19  ;;  %v252_v28 = vsub.f32 %v198_v24, %v2201_v34  ;;  %v253_v49 = vsub.f32 %v198_v24, %v2203_v35  ;;  %v265_v23 = vadd.f32 0.5, %v249_v27  ;;  %v254_v11 = vsub.f32 %v198_v24, %v2205_v36 }
  0xa8   : > { %3283 = vst [vmem:[#allocation22_spill] sm:$0xff] %v2316_v20  ;;  %3284 = vst [vmem:[#allocation23_spill] sm:$0xff] %v2319_v21  ;;  %v430_v29 = vfloor.f32 %v414_v57  ;;  %v2362_v8 = vpop.permute.xlu1 %495  ;;  %v2364_v30 = vpop.permute.xlu0 %491  ;;  %v255_v31 = vsub.f32 %v198_v24, %v2207_v37  ;;  %v432_v17 = vfloor.f32 %v416_v45  ;;  %v267_v32 = vadd.f32 0.5, %v251_v51 }
  0xa9   : > { %3285 = vst [vmem:[#allocation24_spill] sm:$0xff] %v2325_v25  ;;  %3286 = vst [vmem:[#allocation25_spill] sm:$0xff] %v2329_v44  ;;  %v2370_v9 = vsub.f32 %v2362_v8, %v2210_v38  ;;  %v2374_v33 = vsub.f32 %v2362_v8, %v2212_v39  ;;  %v281_v34 = vfloor.f32 %v265_v23  ;;  %v2378_v35 = vsub.f32 %v2364_v30, %v2210_v38 }
  0xaa   : > { %3287 = vst [vmem:[#allocation26_spill] sm:$0xff] %v2364_v30  ;;  %v2382_v36 = vsub.f32 %v2364_v30, %v2212_v39  ;;  %v256_v37 = vsub.f32 %v198_v24, %v2214_v40  ;;  %v283_v45 = vfloor.f32 %v267_v32  ;;  %v266_v57 = vadd.f32 0.5, %v250_v46 }
  0xab   : > { %3288 = vst [vmem:[#allocation27_spill] sm:$0xff] %v2378_v35  ;;  %v268_v16 = vadd.f32 0.5, %v252_v28  ;;  %v269_v7 = vadd.f32 0.5, %v253_v49  ;;  %v270_v12 = vadd.f32 0.5, %v254_v11  ;;  %v271_v10 = vadd.f32 0.5, %v255_v31 }
  0xac   : > { %3289 = vst [vmem:[#allocation28_spill] sm:$0xff] %v2382_v36  ;;  %v272_v2 = vadd.f32 0.5, %v256_v37  ;;  %v297_v15 = vsub.f32 %v249_v27, %v281_v34  ;;  %v282_v21 = vfloor.f32 %v266_v57  ;;  %v299_v20 = vsub.f32 %v251_v51, %v283_v45 }
  0xad   : > { %v284_v23 = vfloor.f32 %v268_v16  ;;  %v285_v13 = vfloor.f32 %v269_v7  ;;  %v286_v38 = vfloor.f32 %v270_v12  ;;  %v287_v35 = vfloor.f32 %v271_v10 }
  0xae   : > { %v288_v44 = vfloor.f32 %v272_v2  ;;  %v313_v25 = vmul.f32 %v297_v15, %v297_v15  ;;  %v298_v39 = vsub.f32 %v250_v46, %v282_v21  ;;  %v315_v24 = vmul.f32 %v299_v20, %v299_v20 }
  0xaf   : > { %v300_v36 = vsub.f32 %v252_v28, %v284_v23  ;;  %v301_v30 = vsub.f32 %v253_v49, %v285_v13  ;;  %v302_v32 = vsub.f32 %v254_v11, %v286_v38  ;;  %v303_v19 = vsub.f32 %v255_v31, %v287_v35 }
  0xb0   : > { %v304_v18 = vsub.f32 %v256_v37, %v288_v44  ;;  %v403_v14 = vsub.f32 %v2321_v22, %v2216_v41  ;;  %v314_v3 = vmul.f32 %v298_v39, %v298_v39  ;;  %v404_v7 = vsub.f32 %v2321_v22, %v2218_v42 }
  0xb1   : > { %v316_v27 = vmul.f32 %v300_v36, %v300_v36  ;;  %v317_v34 = vmul.f32 %v301_v30, %v301_v30  ;;  %v318_v12 = vmul.f32 %v302_v32, %v302_v32  ;;  %v319_v10 = vmul.f32 %v303_v19, %v303_v19 }
  0xb2   : > { %v320_v2 = vmul.f32 %v304_v18, %v304_v18  ;;  %v405_v15 = vsub.f32 %v2321_v22, %v2220_v43  ;;  %v415_v13 = vadd.f32 0.5, %v2339_v48  ;;  %v417_v11 = vadd.f32 0.5, %v2349_v53 }
  0xb3   : > { %v418_v16 = vadd.f32 0.5, %v2353_v26  ;;  %v419_v20 = vadd.f32 0.5, %v403_v14  ;;  %v420_v21 = vadd.f32 0.5, %v404_v7  ;;  %v446_v46 = vsub.f32 %v2335_v47, %v430_v29 }
  0xb4   : > { %v421_v44 = vadd.f32 0.5, %v405_v15  ;;  %v448_v49 = vsub.f32 %v2345_v52, %v432_v17  ;;  %v431_v51 = vfloor.f32 %v415_v13  ;;  %v433_v28 = vfloor.f32 %v417_v11 }
  0xb5   : > { %v434_v19 = vfloor.f32 %v418_v16  ;;  %v435_v18 = vfloor.f32 %v419_v20  ;;  %v436_v30 = vfloor.f32 %v420_v21  ;;  %v462_v22 = vmul.f32 %v446_v46, %v446_v46 }
  0xb6   : > { %v437_v31 = vfloor.f32 %v421_v44  ;;  %v464_v35 = vmul.f32 %v448_v49, %v448_v49  ;;  %v447_v36 = vsub.f32 %v2339_v48, %v431_v51  ;;  %v449_v37 = vsub.f32 %v2349_v53, %v433_v28 }
  0xb7   : > { %v450_v45 = vsub.f32 %v2353_v26, %v434_v19  ;;  %v451_v57 = vsub.f32 %v403_v14, %v435_v18  ;;  %v452_v23 = vsub.f32 %v404_v7, %v436_v30  ;;  %v2399_v47 = vadd.f32 %v462_v22, %v313_v25 }
  0xb8   : > { %v453_v38 = vsub.f32 %v405_v15, %v437_v31  ;;  %v2401_v17 = vadd.f32 %v464_v35, %v315_v24  ;;  %v463_v52 = vmul.f32 %v447_v36, %v447_v36  ;;  %v465_v29 = vmul.f32 %v449_v37, %v449_v37 }
  0xb9   : > { %v466_v39 = vmul.f32 %v450_v45, %v450_v45  ;;  %v467_v48 = vmul.f32 %v451_v57, %v451_v57  ;;  %v468_v14 = vmul.f32 %v452_v23, %v452_v23  ;;  %v548_v25 = vsub.f32 %v2362_v8, %v2228_v50 }
  0xba   : > { %v469_v53 = vmul.f32 %v453_v38, %v453_v38  ;;  %v550_v26 = vsub.f32 %v2362_v8, %v2233_v54  ;;  %v479_v24 = vadd.f32 %v463_v52, %v314_v3  ;;  %v481_v32 = vadd.f32 %v465_v29, %v316_v27 }
  0xbb   : > { %v482_v7 = vadd.f32 %v466_v39, %v317_v34  ;;  %v483_v15 = vadd.f32 %v467_v48, %v318_v12  ;;  %v484_v13 = vadd.f32 %v468_v14, %v319_v10  ;;  %v551_v16 = vsub.f32 %v2362_v8, %v2235_v55 }
  0xbc   : > { %v485_v11 = vadd.f32 %v469_v53, %v320_v2  ;;  %v552_v20 = vsub.f32 %v2362_v8, %v2237_v56  ;;  %v553_v3 = vsub.f32 %v2362_v8, %v2239_v58  ;;  %v554_v27 = vsub.f32 %v2362_v8, %v2241_v59 }
  0xbd   : > { %v563_v34 = vadd.f32 0.5, %v2370_v9  ;;  %v564_v12 = vadd.f32 0.5, %v548_v25  ;;  %v565_v10 = vadd.f32 0.5, %v2374_v33  ;;  %v566_v2 = vadd.f32 0.5, %v550_v26 }
  0xbe   : > { %v567_v21 = vadd.f32 0.5, %v551_v16  ;;  %v568_v44 = vadd.f32 0.5, %v552_v20  ;;  %v569_v46 = vadd.f32 0.5, %v553_v3  ;;  %v570_v8 = vadd.f32 0.5, %v554_v27 }
  0xbf   : > { %v579_v49 = vfloor.f32 %v563_v34  ;;  %v580_v51 = vfloor.f32 %v564_v12  ;;  %v581_v28 = vfloor.f32 %v565_v10  ;;  %v582_v19 = vfloor.f32 %v566_v2 }
  0xc0   : > { %v583_v18 = vfloor.f32 %v567_v21  ;;  %v584_v30 = vfloor.f32 %v568_v44  ;;  %v585_v31 = vfloor.f32 %v569_v46  ;;  %v586_v22 = vfloor.f32 %v570_v8 }
  0xc1   : > { %v595_v35 = vsub.f32 %v2370_v9, %v579_v49  ;;  %v596_v36 = vsub.f32 %v548_v25, %v580_v51  ;;  %v597_v37 = vsub.f32 %v2374_v33, %v581_v28  ;;  %v598_v45 = vsub.f32 %v550_v26, %v582_v19 }
  0xc2   : > { %v599_v57 = vsub.f32 %v551_v16, %v583_v18  ;;  %v600_v23 = vsub.f32 %v552_v20, %v584_v30  ;;  %v601_v38 = vsub.f32 %v553_v3, %v585_v31  ;;  %v602_v52 = vsub.f32 %v554_v27, %v586_v22  ;;  %v3309_v27 = vld [vmem:[#allocation25_spill] sm:$0xff] }
  0xc3   : > { %v611_v29 = vmul.f32 %v595_v35, %v595_v35  ;;  %v612_v39 = vmul.f32 %v596_v36, %v596_v36  ;;  %v613_v9 = vmul.f32 %v597_v37, %v597_v37  ;;  %v614_v14 = vmul.f32 %v598_v45, %v598_v45 }
  0xc4   : > { %v615_v53 = vmul.f32 %v599_v57, %v599_v57  ;;  %v616_v33 = vmul.f32 %v600_v23, %v600_v23  ;;  %v617_v26 = vmul.f32 %v601_v38, %v601_v38  ;;  %v618_v16 = vmul.f32 %v602_v52, %v602_v52  ;;  %v3304_v23 = vld [vmem:[#allocation8_spill] sm:$0xff] }
  0xc5   : > { %v627_v20 = vadd.f32 %v611_v29, %v2399_v47  ;;  %v628_v3 = vadd.f32 %v612_v39, %v479_v24  ;;  %v629_v34 = vadd.f32 %v613_v9, %v2401_v17  ;;  %v630_v12 = vadd.f32 %v614_v14, %v481_v32  ;;  %v3305_v14 = vld [vmem:[#allocation16_spill] sm:$0xff] }
  0xc6   : > { %v631_v10 = vadd.f32 %v615_v53, %v482_v7  ;;  %v632_v2 = vadd.f32 %v616_v33, %v483_v15  ;;  %v633_v24 = vadd.f32 %v617_v26, %v484_v13  ;;  %v634_v21 = vadd.f32 %v618_v16, %v485_v11  ;;  %v3306_v33 = vld [vmem:[#allocation20_spill] sm:$0xff]  ;;  %v3307_v26 = vld [vmem:[#allocation21_spill] sm:$0xff]  ;;  %v3312_v13 = vld [vmem:[#allocation15_spill] sm:$0xff] }
  0xc7   : > { %v685_v44 = vand.u32 4294965248, %v627_v20  ;;  %v686_v46 = vand.u32 4294965248, %v628_v3  ;;  %v687_v32 = vand.u32 4294965248, %v629_v34  ;;  %v688_v7 = vand.u32 4294965248, %v630_v12  ;;  %v3308_v20 = vld [vmem:[#allocation24_spill] sm:$0xff] }
  0xc8   : > { %v689_v15 = vand.u32 4294965248, %v631_v10  ;;  %v690_v8 = vand.u32 4294965248, %v632_v2  ;;  %v691_v11 = vand.u32 4294965248, %v633_v24  ;;  %v692_v49 = vand.u32 4294965248, %v634_v21  ;;  %v2557_v10 = vld [vmem:[#allocation2 + $0x8] sm:$0xff] }
  0xc9   : > { %v701_v51 = vor.u32 %v685_v44, %v2244_v60  ;;  %v702_v28 = vor.u32 %v686_v46, %v2246_v61  ;;  %v703_v19 = vor.u32 %v687_v32, %v2248_v62  ;;  %v704_v18 = vor.u32 %v688_v7, %v2250_v63 }
  0xca   : > { %v705_v30 = vor.u32 %v689_v15, %v2252_v0  ;;  %v706_v31 = vor.u32 %v690_v8, %v2254_v1  ;;  %v707_v22 = vor.u32 %v691_v11, %v2260_v4  ;;  %v708_v35 = vor.u32 %v692_v49, %v2262_v5  ;;  %v3310_v15 = vld [vmem:[#allocation22_spill] sm:$0xff] }
  0xcb   : > { %v2519_v36 = vsel %vm2448_vm14, 3e+38, %v701_v51  ;;  %v2523_v37 = vsel %vm2457_vm15, 3e+38, %v702_v28  ;;  %v2527_v45 = vsel %vm2467_vm0, 3e+38, %v703_v19  ;;  %v248_v38 = vsub.f32 %v3304_v23, %v2214_v40 }
  0xcc   : > { %v2531_v6 = vsel %vm2477_vm2, 3e+38, %v704_v18  ;;  %v2535_v57 = vsel %vm2486_vm4, 3e+38, %v705_v30  ;;  %v2541_v52 = vsel %vm2495_vm6, 3e+38, %v706_v31  ;;  %v793_v48 = vmin.f32 %v2519_v36, %v2527_v45 }
  0xcd   : > { %v2543_v29 = vsel %vm763_vm8, 3e+38, %v707_v22  ;;  %v2545_v39 = vsel %vm764_vm9, 3e+38, %v708_v35  ;;  %v794_v9 = vmin.f32 %v2523_v37, %v2531_v6  ;;  %v258_v53 = vadd.f32 0.5, %v3305_v14  ;;  %v3313_v51 = vld [vmem:[#allocation23_spill] sm:$0xff] }
  0xce   : > { %v260_v25 = vadd.f32 0.5, %v3306_v33  ;;  %v261_v40 = vadd.f32 0.5, %v3307_v26  ;;  %v795_v16 = vmin.f32 %v793_v48, %v2535_v57  ;;  %v262_v3 = vadd.f32 0.5, %v3308_v20  ;;  %v3315_v19 = vld [vmem:[#allocation17_spill] sm:$0xff] }
  0xcf   : > { %v263_v34 = vadd.f32 0.5, %v3309_v27  ;;  %v264_v12 = vadd.f32 0.5, %v248_v38  ;;  %v796_v2 = vmin.f32 %v794_v9, %v2541_v52  ;;  %v274_v47 = vfloor.f32 %v258_v53 }
  0xd0   : > { %v276_v24 = vfloor.f32 %v260_v25  ;;  %v277_v21 = vfloor.f32 %v261_v40  ;;  %v797_v44 = vmin.f32 %v795_v16, %v2543_v29  ;;  %v278_v46 = vfloor.f32 %v262_v3 }
  0xd1   : > { %v279_v17 = vfloor.f32 %v263_v34  ;;  %v280_v32 = vfloor.f32 %v264_v12  ;;  %v798_v7 = vmin.f32 %v796_v2, %v2545_v39  ;;  %v3311_v8 = vfloor.f32 %v3310_v15  ;;  %v3316_v2 = vld [vmem:[#allocation7_spill] sm:$0xff] }
  0xd2   : > { %v290_v49 = vsub.f32 %v3305_v14, %v274_v47  ;;  %v3314_v28 = vfloor.f32 %v3313_v51  ;;  %v799_v30 = vmin.f32 %v797_v44, %v2557_v10  ;;  %v292_v31 = vsub.f32 %v3306_v33, %v276_v24 }
  0xd3   : > { %v289_v11 = vsub.f32 %v3312_v13, %v3311_v8  ;;  %v293_v22 = vsub.f32 %v3307_v26, %v277_v21  ;;  %v294_v35 = vsub.f32 %v3308_v20, %v278_v46  ;;  %v295_v23 = vsub.f32 %v3309_v27, %v279_v17  ;;  %v3318_v27 = vld [vmem:[#allocation13_spill] sm:$0xff]  ;;  %v3319_v21 = vld [vmem:[#allocation14_spill] sm:$0xff]  ;;  %v3323_v8 = vld [vmem:[#allocation19_spill] sm:$0xff] }
  0xd4   : > { %v291_v18 = vsub.f32 %v3315_v19, %v3314_v28  ;;  %v296_v48 = vsub.f32 %v248_v38, %v280_v32  ;;  %v306_v53 = vmul.f32 %v290_v49, %v290_v49  ;;  %v800_v25 = vmin.f32 %v799_v30, %v798_v7  ;;  %v3317_v38 = vld [vmem:[#allocation11_spill] sm:$0xff]  ;;  %v3320_v17 = vld [vmem:[#allocation18_spill] sm:$0xff]  ;;  %v3325_v13 = vld [vmem:[#allocation12_spill] sm:$0xff] }
  0xd5   : > { %v305_v9 = vmul.f32 %v289_v11, %v289_v11  ;;  %v308_v14 = vmul.f32 %v292_v31, %v292_v31  ;;  %v309_v16 = vmul.f32 %v293_v22, %v293_v22  ;;  %v310_v3 = vmul.f32 %v294_v35, %v294_v35  ;;  %v3322_v7 = vld [vmem:[#allocation10_spill] sm:$0xff] }
  0xd6   : > { %v307_v40 = vmul.f32 %v291_v18, %v291_v18  ;;  %v311_v34 = vmul.f32 %v295_v23, %v295_v23  ;;  %v312_v12 = vmul.f32 %v296_v48, %v296_v48  ;;  %v395_v47 = vsub.f32 %v3316_v2, %v2216_v41  ;;  %801 = vmin.xlane.f32.xlu0 %v800_v25 }
  0xd7   : > { %v396_v33 = vsub.f32 %v3316_v2, %v2218_v42  ;;  %v397_v26 = vsub.f32 %v3316_v2, %v2220_v43  ;;  %v407_v20 = vadd.f32 0.5, %v3317_v38  ;;  %v409_v24 = vadd.f32 0.5, %v3318_v27 }
  0xd8   : > { %v410_v44 = vadd.f32 0.5, %v3319_v21  ;;  %v411_v46 = vadd.f32 0.5, %v395_v47  ;;  %v3321_v32 = vfloor.f32 %v3320_v17  ;;  %v3324_v41 = vfloor.f32 %v3323_v8 }
  0xd9   : > { %v412_v49 = vadd.f32 0.5, %v396_v33  ;;  %v413_v42 = vadd.f32 0.5, %v397_v26  ;;  %v423_v51 = vfloor.f32 %v407_v20  ;;  %v425_v28 = vfloor.f32 %v409_v24 }
  0xda   : > { %v438_v15 = vsub.f32 %v3322_v7, %v3321_v32  ;;  %v440_v11 = vsub.f32 %v3325_v13, %v3324_v41  ;;  %v426_v43 = vfloor.f32 %v410_v44  ;;  %v427_v19 = vfloor.f32 %v411_v46  ;;  %v3326_v46 = vld [vmem:[#allocation26_spill] sm:$0xff] }
  0xdb   : > { %v428_v31 = vfloor.f32 %v412_v49  ;;  %v429_v22 = vfloor.f32 %v413_v42  ;;  %v439_v35 = vsub.f32 %v3317_v38, %v423_v51  ;;  %v441_v23 = vsub.f32 %v3318_v27, %v425_v28 }
  0xdc   : > { %v454_v18 = vmul.f32 %v438_v15, %v438_v15  ;;  %v456_v30 = vmul.f32 %v440_v11, %v440_v11  ;;  %v442_v48 = vsub.f32 %v3319_v21, %v426_v43  ;;  %v443_v25 = vsub.f32 %v395_v47, %v427_v19 }
  0xdd   : > { %v444_v32 = vsub.f32 %v396_v33, %v428_v31  ;;  %v445_v7 = vsub.f32 %v397_v26, %v429_v22  ;;  %v455_v8 = vmul.f32 %v439_v35, %v439_v35  ;;  %v457_v20 = vmul.f32 %v441_v23, %v441_v23  ;;  %v3327_v33 = vld [vmem:[#allocation9_spill] sm:$0xff] }
  0xde   : > { %v470_v2 = vadd.f32 %v454_v18, %v305_v9  ;;  %v472_v17 = vadd.f32 %v456_v30, %v307_v40  ;;  %v458_v24 = vmul.f32 %v442_v48, %v442_v48  ;;  %v459_v44 = vmul.f32 %v443_v25, %v443_v25 }
  0xdf   : > { %v540_v15 = vsub.f32 %v3326_v46, %v2228_v50  ;;  %v542_v41 = vsub.f32 %v3326_v46, %v2233_v54  ;;  %v460_v38 = vmul.f32 %v444_v32, %v444_v32  ;;  %v461_v13 = vmul.f32 %v445_v7, %v445_v7 }
  0xe0   : > { %v471_v27 = vadd.f32 %v455_v8, %v306_v53  ;;  %v473_v11 = vadd.f32 %v457_v20, %v308_v14  ;;  %v474_v21 = vadd.f32 %v458_v24, %v309_v16  ;;  %v475_v47 = vadd.f32 %v459_v44, %v310_v3  ;;  %v3328_v14 = vld [vmem:[#allocation27_spill] sm:$0xff]  ;;  %v3329_v3 = vld [vmem:[#allocation28_spill] sm:$0xff] }
  0xe1   : > { %v543_v9 = vsub.f32 %v3326_v46, %v2235_v55  ;;  %v544_v40 = vsub.f32 %v3326_v46, %v2237_v56  ;;  %vm725_vm9 = vcmp.eq.s32.totalorder %v2244_v60, %v3327_v33  ;;  %v476_v26 = vadd.f32 %v460_v38, %v311_v34 }
  0xe2   : > { %v477_v50 = vadd.f32 %v461_v13, %v312_v12  ;;  %v545_v54 = vsub.f32 %v3326_v46, %v2239_v58  ;;  %v546_v53 = vsub.f32 %v3326_v46, %v2241_v59  ;;  %vm726_vm11 = vcmp.eq.s32.totalorder %v2246_v61, %v3327_v33  ;;  %vm2627_vm4 = vmor %vm725_vm9, %vm741_vm1 }
  0xe3   : > { %v555_v16 = vadd.f32 0.5, %v3328_v14  ;;  %v556_v55 = vadd.f32 0.5, %v540_v15  ;;  %v557_v49 = vadd.f32 0.5, %v3329_v3  ;;  %v558_v56 = vadd.f32 0.5, %v542_v41  ;;  %vm2636_vm6 = vmor %vm726_vm11, %vm742_vm3 }
  0xe4   : > { %vm727_vm12 = vcmp.eq.s32.totalorder %v2248_v62, %v3327_v33  ;;  %v559_v34 = vadd.f32 0.5, %v543_v9  ;;  %v560_v12 = vadd.f32 0.5, %v544_v40  ;;  %v561_v42 = vadd.f32 0.5, %v545_v54 }
  0xe5   : > { %v562_v51 = vadd.f32 0.5, %v546_v53  ;;  %vm728_vm14 = vcmp.eq.s32.totalorder %v2250_v63, %v3327_v33  ;;  %v571_v58 = vfloor.f32 %v555_v16  ;;  %v572_v59 = vfloor.f32 %v556_v55  ;;  %vm751_vm1 = vmor %vm727_vm12, %vm743_vm5 }
  0xe6   : > { %v573_v28 = vfloor.f32 %v557_v49  ;;  %v574_v43 = vfloor.f32 %v558_v56  ;;  %vm729_vm15 = vcmp.eq.s32.totalorder %v2252_v0, %v3327_v33  ;;  %v575_v19 = vfloor.f32 %v559_v34  ;;  %vm752_vm3 = vmor %vm728_vm14, %vm744_vm7 }
  0xe7   : > { %v576_v18 = vfloor.f32 %v560_v12  ;;  %v577_v30 = vfloor.f32 %v561_v42  ;;  %v578_v31 = vfloor.f32 %v562_v51  ;;  %vm730_vm0 = vcmp.eq.s32.totalorder %v2254_v1, %v3327_v33 }
  0xe8   : > { %v587_v22 = vsub.f32 %v3328_v14, %v571_v58  ;;  %v588_v35 = vsub.f32 %v540_v15, %v572_v59  ;;  %v589_v23 = vsub.f32 %v3329_v3, %v573_v28  ;;  %v590_v48 = vsub.f32 %v542_v41, %v574_v43 }
  0xe9   : > { %vm731_vm2 = vcmp.eq.s32.totalorder %v2260_v4, %v3327_v33  ;;  %v591_v25 = vsub.f32 %v543_v9, %v575_v19  ;;  %v592_v32 = vsub.f32 %v544_v40, %v576_v18  ;;  %v593_v7 = vsub.f32 %v545_v54, %v577_v30 }
  0xea   : > { %v594_v8 = vsub.f32 %v546_v53, %v578_v31  ;;  %v603_v20 = vmul.f32 %v587_v22, %v587_v22  ;;  %v604_v24 = vmul.f32 %v588_v35, %v588_v35  ;;  %v605_v44 = vmul.f32 %v589_v23, %v589_v23  ;;  %vm755_vm11 = vmor %vm731_vm2, %vm747_vm13  ;;  %v781_v22 = vld [vmem:[#allocation2] sm:$0xff] }
  0xeb   : > { %v606_v46 = vmul.f32 %v590_v48, %v590_v48  ;;  %v607_v38 = vmul.f32 %v591_v25, %v591_v25  ;;  %v608_v13 = vmul.f32 %v592_v32, %v592_v32  ;;  %v609_v16 = vmul.f32 %v593_v7, %v593_v7 }
  0xec   : > { %v610_v55 = vmul.f32 %v594_v8, %v594_v8  ;;  %v619_v14 = vadd.f32 %v603_v20, %v470_v2  ;;  %v620_v15 = vadd.f32 %v604_v24, %v471_v27  ;;  %v621_v49 = vadd.f32 %v605_v44, %v472_v17 }
  0xed   : > { %v622_v3 = vadd.f32 %v606_v46, %v473_v11  ;;  %v623_v41 = vadd.f32 %v607_v38, %v474_v21  ;;  %v624_v56 = vadd.f32 %v608_v13, %v475_v47  ;;  %v625_v34 = vadd.f32 %v609_v16, %v476_v26 }
  0xee   : > { %v626_v12 = vadd.f32 %v610_v55, %v477_v50  ;;  %v677_v40 = vand.u32 4294965248, %v619_v14  ;;  %v678_v54 = vand.u32 4294965248, %v620_v15  ;;  %v679_v53 = vand.u32 4294965248, %v621_v49 }
  0xef   : > { %v680_v2 = vand.u32 4294965248, %v622_v3  ;;  %v681_v27 = vand.u32 4294965248, %v623_v41  ;;  %v682_v11 = vand.u32 4294965248, %v624_v56  ;;  %v683_v21 = vand.u32 4294965248, %v625_v34 }
  0xf0   : > { %v684_v47 = vand.u32 4294965248, %v626_v12  ;;  %v693_v26 = vor.u32 %v677_v40, %v2244_v60  ;;  %v694_v50 = vor.u32 %v678_v54, %v2246_v61  ;;  %v695_v42 = vor.u32 %v679_v53, %v2248_v62 }
  0xf1   : > { %v696_v51 = vor.u32 %v680_v2, %v2250_v63  ;;  %v697_v58 = vor.u32 %v681_v27, %v2252_v0  ;;  %v698_v59 = vor.u32 %v682_v11, %v2254_v1  ;;  %vm732_vm5 = vcmp.eq.s32.totalorder %v2262_v5, %v3327_v33 }
  0xf2   : > { %vm3334_vm8 = vcmp.ge.s32.totalorder %v2252_v0, 1500  ;;  %v699_v60 = vor.u32 %v683_v21, %v2260_v4  ;;  %vm3335_vm9 = vcmp.ge.s32.totalorder %v2254_v1, 1500  ;;  %v765_v61 = vsel %vm2627_vm4, 3e+38, %v693_v26 }
  0xf3   : > { %vm753_vm10 = vmor %vm729_vm15, %vm3334_vm8  ;;  %v766_v62 = vsel %vm2636_vm6, 3e+38, %v694_v50  ;;  %v767_v63 = vsel %vm751_vm1, 3e+38, %v695_v42  ;;  %v768_v0 = vsel %vm752_vm3, 3e+38, %v696_v51  ;;  %v700_v43 = vor.u32 %v684_v47, %v2262_v5 }
  0xf4   : > { %vm754_vm7 = vmor %vm730_vm0, %vm3335_vm9  ;;  %v783_v28 = vmin.f32 %v765_v61, %v767_v63  ;;  %v769_v19 = vsel %vm753_vm10, 3e+38, %v697_v58  ;;  %v784_v1 = vmin.f32 %v766_v62, %v768_v0  ;;  %vm3336_vm12 = vcmp.ge.s32.totalorder %v2262_v5, 1500 }
  0xf5   : > { %vm756_vm14 = vmor %vm732_vm5, %vm3336_vm12  ;;  %v770_v18 = vsel %vm754_vm7, 3e+38, %v698_v59  ;;  %v771_v31 = vsel %vm755_vm11, 3e+38, %v699_v60 }
  0xf6   : > { %v785_v30 = vmin.f32 %v783_v28, %v769_v19  ;;  %v786_v35 = vmin.f32 %v784_v1, %v770_v18  ;;  %v772_v48 = vsel %vm756_vm14, 3e+38, %v700_v43 }
  0xf8   : > { %v787_v23 = vmin.f32 %v785_v30, %v771_v31  ;;  %v788_v25 = vmin.f32 %v786_v35, %v772_v48 }
  0xfa   : > { %v789_v32 = vmin.f32 %v787_v23, %v781_v22 }
  0xfc   : > { %v790_v4 = vmin.f32 %v789_v32, %v788_v25 }
  0xfe   : > { %791 = vmin.xlane.f32.xlu1 %v790_v4 }
 0x15f   : > { %v2681_v33 = vpop.xlane.xlu0 %801 }
 0x160   : > { %vm815_vm13 = vcmp.eq.f32.partialorder %v2519_v36, %v2681_v33  ;;  %vm816_vm15 = vcmp.eq.f32.partialorder %v2523_v37, %v2681_v33  ;;  %vm817_vm0 = vcmp.eq.f32.partialorder %v2527_v45, %v2681_v33  ;;  %vm818_vm2 = vcmp.eq.f32.partialorder %v2531_v6, %v2681_v33 }
 0x161   : > { %vm819_vm4 = vcmp.eq.f32.partialorder %v2535_v57, %v2681_v33  ;;  %v833_v5 = vsel %vm815_vm13, 3e+38, %v2519_v36  ;;  %v834_v7 = vsel %vm816_vm15, 3e+38, %v2523_v37  ;;  %vm820_vm6 = vcmp.eq.f32.partialorder %v2541_v52, %v2681_v33 }
 0x162   : > { %v835_v8 = vsel %vm817_vm0, 3e+38, %v2527_v45  ;;  %v836_v20 = vsel %vm818_vm2, 3e+38, %v2531_v6  ;;  %vm821_vm1 = vcmp.eq.f32.partialorder %v2543_v29, %v2681_v33  ;;  %v837_v44 = vsel %vm819_vm4, 3e+38, %v2535_v57 }
 0x163   : > { %v852_v24 = vmin.f32 %v833_v5, %v835_v8  ;;  %v853_v46 = vmin.f32 %v834_v7, %v836_v20  ;;  %vm822_vm3 = vcmp.eq.f32.partialorder %v2545_v39, %v2681_v33  ;;  %vm823_vm5 = vcmp.eq.f32.partialorder %v2557_v10, %v2681_v33 }
 0x164   : > { %v838_v36 = vsel %vm820_vm6, 3e+38, %v2541_v52  ;;  %v839_v45 = vsel %vm821_vm1, 3e+38, %v2543_v29  ;;  %v840_v13 = vsel %vm822_vm3, 3e+38, %v2545_v39 }
 0x165   : > { %v854_v37 = vmin.f32 %v852_v24, %v837_v44  ;;  %v855_v38 = vmin.f32 %v853_v46, %v838_v36  ;;  %v841_v16 = vsel %vm823_vm5, 3e+38, %v2557_v10 }
 0x167   : > { %v856_v6 = vmin.f32 %v854_v37, %v839_v45  ;;  %v857_v55 = vmin.f32 %v855_v38, %v840_v13 }
 0x169   : > { %v858_v57 = vmin.f32 %v856_v6, %v841_v16 }
 0x16b   : > { %v859_v14 = vmin.f32 %v858_v57, %v857_v55 }
 0x16d   : > { %860 = vmin.xlane.f32.xlu1 %v859_v14 }
 0x187   : > { %v2710_v15 = vpop.xlane.xlu1 %791 }
 0x188   : > { %vm806_vm8 = vcmp.eq.f32.partialorder %v765_v61, %v2710_v15  ;;  %vm807_vm10 = vcmp.eq.f32.partialorder %v766_v62, %v2710_v15  ;;  %vm808_vm9 = vcmp.eq.f32.partialorder %v767_v63, %v2710_v15  ;;  %vm809_vm7 = vcmp.eq.f32.partialorder %v768_v0, %v2710_v15 }
 0x189   : > { %vm810_vm11 = vcmp.eq.f32.partialorder %v769_v19, %v2710_v15  ;;  %v824_v52 = vsel %vm806_vm8, 3e+38, %v765_v61  ;;  %v825_v29 = vsel %vm807_vm10, 3e+38, %v766_v62  ;;  %vm811_vm12 = vcmp.eq.f32.partialorder %v770_v18, %v2710_v15 }
 0x18a   : > { %v826_v39 = vsel %vm808_vm9, 3e+38, %v767_v63  ;;  %v827_v10 = vsel %vm809_vm7, 3e+38, %v768_v0  ;;  %vm812_vm14 = vcmp.eq.f32.partialorder %v771_v31, %v2710_v15  ;;  %v828_v3 = vsel %vm810_vm11, 3e+38, %v769_v19 }
 0x18b   : > { %v842_v49 = vmin.f32 %v824_v52, %v826_v39  ;;  %v843_v41 = vmin.f32 %v825_v29, %v827_v10  ;;  %vm813_vm13 = vcmp.eq.f32.partialorder %v772_v48, %v2710_v15  ;;  %vm814_vm15 = vcmp.eq.f32.partialorder %v781_v22, %v2710_v15 }
 0x18c   : > { %v829_v56 = vsel %vm811_vm12, 3e+38, %v770_v18  ;;  %v830_v12 = vsel %vm812_vm14, 3e+38, %v771_v31  ;;  %v831_v54 = vsel %vm813_vm13, 3e+38, %v772_v48 }
 0x18d   : > { %v844_v34 = vmin.f32 %v842_v49, %v828_v3  ;;  %v845_v9 = vmin.f32 %v843_v41, %v829_v56  ;;  %v832_v53 = vsel %vm814_vm15, 3e+38, %v781_v22 }
 0x18f   : > { %v846_v40 = vmin.f32 %v844_v34, %v830_v12  ;;  %v847_v2 = vmin.f32 %v845_v9, %v831_v54 }
 0x191   : > { %v848_v17 = vmin.f32 %v846_v40, %v832_v53 }
 0x193   : > { %v849_v27 = vmin.f32 %v848_v17, %v847_v2 }
 0x195   : > { %850 = vmin.xlane.f32.xlu0 %v849_v27 }
 0x1f6   : > { %v2721_v11 = vpop.xlane.xlu1 %860 }
 0x1f7   : > { %vm874_vm0 = vcmp.eq.f32.partialorder %v833_v5, %v2721_v11  ;;  %vm875_vm2 = vcmp.eq.f32.partialorder %v834_v7, %v2721_v11  ;;  %vm876_vm4 = vcmp.eq.f32.partialorder %v835_v8, %v2721_v11  ;;  %vm877_vm6 = vcmp.eq.f32.partialorder %v836_v20, %v2721_v11 }
 0x1f8   : > { %vm878_vm1 = vcmp.eq.f32.partialorder %v837_v44, %v2721_v11  ;;  %v892_v21 = vsel %vm874_vm0, 3e+38, %v833_v5  ;;  %v893_v47 = vsel %vm875_vm2, 3e+38, %v834_v7  ;;  %vm879_vm3 = vcmp.eq.f32.partialorder %v838_v36, %v2721_v11 }
 0x1f9   : > { %v894_v26 = vsel %vm876_vm4, 3e+38, %v835_v8  ;;  %v895_v50 = vsel %vm877_vm6, 3e+38, %v836_v20  ;;  %vm880_vm5 = vcmp.eq.f32.partialorder %v839_v45, %v2721_v11  ;;  %v896_v51 = vsel %vm878_vm1, 3e+38, %v837_v44 }
 0x1fa   : > { %v911_v42 = vmin.f32 %v892_v21, %v894_v26  ;;  %v912_v58 = vmin.f32 %v893_v47, %v895_v50  ;;  %vm881_vm8 = vcmp.eq.f32.partialorder %v840_v13, %v2721_v11  ;;  %vm882_vm10 = vcmp.eq.f32.partialorder %v841_v16, %v2721_v11 }
 0x1fb   : > { %v897_v59 = vsel %vm879_vm3, 3e+38, %v838_v36  ;;  %v898_v61 = vsel %vm880_vm5, 3e+38, %v839_v45  ;;  %v899_v0 = vsel %vm881_vm8, 3e+38, %v840_v13 }
 0x1fc   : > { %v913_v60 = vmin.f32 %v911_v42, %v896_v51  ;;  %v914_v62 = vmin.f32 %v912_v58, %v897_v59  ;;  %v900_v28 = vsel %vm882_vm10, 3e+38, %v841_v16 }
 0x1fe   : > { %v915_v63 = vmin.f32 %v913_v60, %v898_v61  ;;  %v916_v43 = vmin.f32 %v914_v62, %v899_v0 }
 0x200   : > { %v917_v19 = vmin.f32 %v915_v63, %v900_v28 }
 0x202   : > { %v918_v1 = vmin.f32 %v917_v19, %v916_v43 }
 0x204   : > { %919 = vmin.xlane.f32.xlu1 %v918_v1 }
 0x21e   : > { %v2732_v18 = vpop.xlane.xlu0 %850 }
 0x21f   : > { %vm865_vm9 = vcmp.eq.f32.partialorder %v824_v52, %v2732_v18  ;;  %vm866_vm7 = vcmp.eq.f32.partialorder %v825_v29, %v2732_v18  ;;  %vm867_vm11 = vcmp.eq.f32.partialorder %v826_v39, %v2732_v18  ;;  %vm868_vm12 = vcmp.eq.f32.partialorder %v827_v10, %v2732_v18 }
 0x220   : > { %vm869_vm14 = vcmp.eq.f32.partialorder %v828_v3, %v2732_v18  ;;  %v883_v30 = vsel %vm865_vm9, 3e+38, %v824_v52  ;;  %v884_v31 = vsel %vm866_vm7, 3e+38, %v825_v29  ;;  %vm870_vm13 = vcmp.eq.f32.partialorder %v829_v56, %v2732_v18 }
 0x221   : > { %v885_v22 = vsel %vm867_vm11, 3e+38, %v826_v39  ;;  %v886_v35 = vsel %vm868_vm12, 3e+38, %v827_v10  ;;  %vm871_vm15 = vcmp.eq.f32.partialorder %v830_v12, %v2732_v18  ;;  %v887_v48 = vsel %vm869_vm14, 3e+38, %v828_v3 }
 0x222   : > { %v901_v23 = vmin.f32 %v883_v30, %v885_v22  ;;  %v902_v25 = vmin.f32 %v884_v31, %v886_v35  ;;  %vm872_vm0 = vcmp.eq.f32.partialorder %v831_v54, %v2732_v18  ;;  %vm873_vm2 = vcmp.eq.f32.partialorder %v832_v53, %v2732_v18 }
 0x223   : > { %v888_v32 = vsel %vm870_vm13, 3e+38, %v829_v56  ;;  %v889_v5 = vsel %vm871_vm15, 3e+38, %v830_v12  ;;  %v890_v20 = vsel %vm872_vm0, 3e+38, %v831_v54 }
 0x224   : > { %v903_v4 = vmin.f32 %v901_v23, %v887_v48  ;;  %v904_v7 = vmin.f32 %v902_v25, %v888_v32  ;;  %v891_v24 = vsel %vm873_vm2, 3e+38, %v832_v53 }
 0x226   : > { %v905_v8 = vmin.f32 %v903_v4, %v889_v5  ;;  %v906_v44 = vmin.f32 %v904_v7, %v890_v20 }
 0x228   : > { %v907_v46 = vmin.f32 %v905_v8, %v891_v24 }
 0x22a   : > { %v908_v36 = vmin.f32 %v907_v46, %v906_v44 }
 0x22c   : > { %909 = vmin.xlane.f32.xlu0 %v908_v36 }
 0x28d   : > { %v2743_v37 = vpop.xlane.xlu1 %919 }
 0x28e   : > { %vm933_vm4 = vcmp.eq.f32.partialorder %v892_v21, %v2743_v37  ;;  %vm934_vm6 = vcmp.eq.f32.partialorder %v893_v47, %v2743_v37  ;;  %vm935_vm1 = vcmp.eq.f32.partialorder %v894_v26, %v2743_v37  ;;  %vm936_vm3 = vcmp.eq.f32.partialorder %v895_v50, %v2743_v37 }
 0x28f   : > { %vm937_vm5 = vcmp.eq.f32.partialorder %v896_v51, %v2743_v37  ;;  %v951_v45 = vsel %vm933_vm4, 3e+38, %v892_v21  ;;  %v952_v38 = vsel %vm934_vm6, 3e+38, %v893_v47  ;;  %vm938_vm8 = vcmp.eq.f32.partialorder %v897_v59, %v2743_v37 }
 0x290   : > { %v953_v6 = vsel %vm935_vm1, 3e+38, %v894_v26  ;;  %v954_v13 = vsel %vm936_vm3, 3e+38, %v895_v50  ;;  %vm939_vm10 = vcmp.eq.f32.partialorder %v898_v61, %v2743_v37  ;;  %v955_v55 = vsel %vm937_vm5, 3e+38, %v896_v51 }
 0x291   : > { %v970_v16 = vmin.f32 %v951_v45, %v953_v6  ;;  %v971_v57 = vmin.f32 %v952_v38, %v954_v13  ;;  %vm940_vm9 = vcmp.eq.f32.partialorder %v899_v0, %v2743_v37  ;;  %vm941_vm7 = vcmp.eq.f32.partialorder %v900_v28, %v2743_v37 }
 0x292   : > { %v956_v14 = vsel %vm938_vm8, 3e+38, %v897_v59  ;;  %v957_v29 = vsel %vm939_vm10, 3e+38, %v898_v61  ;;  %v958_v49 = vsel %vm940_vm9, 3e+38, %v899_v0 }
 0x293   : > { %v972_v52 = vmin.f32 %v970_v16, %v955_v55  ;;  %v973_v39 = vmin.f32 %v971_v57, %v956_v14  ;;  %v959_v3 = vsel %vm941_vm7, 3e+38, %v900_v28 }
 0x295   : > { %v974_v10 = vmin.f32 %v972_v52, %v957_v29  ;;  %v975_v41 = vmin.f32 %v973_v39, %v958_v49 }
 0x297   : > { %v976_v56 = vmin.f32 %v974_v10, %v959_v3 }
 0x299   : > { %v977_v34 = vmin.f32 %v976_v56, %v975_v41 }
 0x29b   : > { %978 = vmin.xlane.f32.xlu1 %v977_v34 }
 0x2b5   : > { %v2754_v12 = vpop.xlane.xlu0 %909 }
 0x2b6   : > { %vm924_vm11 = vcmp.eq.f32.partialorder %v883_v30, %v2754_v12  ;;  %vm925_vm12 = vcmp.eq.f32.partialorder %v884_v31, %v2754_v12  ;;  %vm926_vm14 = vcmp.eq.f32.partialorder %v885_v22, %v2754_v12  ;;  %vm927_vm13 = vcmp.eq.f32.partialorder %v886_v35, %v2754_v12 }
 0x2b7   : > { %vm928_vm15 = vcmp.eq.f32.partialorder %v887_v48, %v2754_v12  ;;  %v942_v9 = vsel %vm924_vm11, 3e+38, %v883_v30  ;;  %v943_v40 = vsel %vm925_vm12, 3e+38, %v884_v31  ;;  %vm929_vm0 = vcmp.eq.f32.partialorder %v888_v32, %v2754_v12 }
 0x2b8   : > { %v944_v54 = vsel %vm926_vm14, 3e+38, %v885_v22  ;;  %v945_v53 = vsel %vm927_vm13, 3e+38, %v886_v35  ;;  %vm930_vm2 = vcmp.eq.f32.partialorder %v889_v5, %v2754_v12  ;;  %v946_v17 = vsel %vm928_vm15, 3e+38, %v887_v48 }
 0x2b9   : > { %v960_v2 = vmin.f32 %v942_v9, %v944_v54  ;;  %v961_v27 = vmin.f32 %v943_v40, %v945_v53  ;;  %vm931_vm4 = vcmp.eq.f32.partialorder %v890_v20, %v2754_v12  ;;  %vm932_vm6 = vcmp.eq.f32.partialorder %v891_v24, %v2754_v12 }
 0x2ba   : > { %v947_v21 = vsel %vm929_vm0, 3e+38, %v888_v32  ;;  %v948_v26 = vsel %vm930_vm2, 3e+38, %v889_v5  ;;  %v949_v51 = vsel %vm931_vm4, 3e+38, %v890_v20 }
 0x2bb   : > { %v962_v47 = vmin.f32 %v960_v2, %v946_v17  ;;  %v963_v50 = vmin.f32 %v961_v27, %v947_v21  ;;  %v950_v58 = vsel %vm932_vm6, 3e+38, %v891_v24 }
 0x2bd   : > { %v964_v42 = vmin.f32 %v962_v47, %v948_v26  ;;  %v965_v59 = vmin.f32 %v963_v50, %v949_v51 }
 0x2bf   : > { %v966_v60 = vmin.f32 %v964_v42, %v950_v58 }
 0x2c1   : > { %v967_v61 = vmin.f32 %v966_v60, %v965_v59 }
 0x2c3   : > { %968 = vmin.xlane.f32.xlu0 %v967_v61 }
 0x324   : > { %v2765_v62 = vpop.xlane.xlu1 %978 }
 0x325   : > { %vm992_vm1 = vcmp.eq.f32.partialorder %v951_v45, %v2765_v62  ;;  %vm993_vm3 = vcmp.eq.f32.partialorder %v952_v38, %v2765_v62  ;;  %vm994_vm5 = vcmp.eq.f32.partialorder %v953_v6, %v2765_v62  ;;  %vm995_vm8 = vcmp.eq.f32.partialorder %v954_v13, %v2765_v62 }
 0x326   : > { %vm996_vm10 = vcmp.eq.f32.partialorder %v955_v55, %v2765_v62  ;;  %v1010_v63 = vsel %vm992_vm1, 3e+38, %v951_v45  ;;  %v1011_v0 = vsel %vm993_vm3, 3e+38, %v952_v38  ;;  %vm997_vm9 = vcmp.eq.f32.partialorder %v956_v14, %v2765_v62 }
 0x327   : > { %v1012_v28 = vsel %vm994_vm5, 3e+38, %v953_v6  ;;  %v1013_v43 = vsel %vm995_vm8, 3e+38, %v954_v13  ;;  %vm998_vm7 = vcmp.eq.f32.partialorder %v957_v29, %v2765_v62  ;;  %v1014_v1 = vsel %vm996_vm10, 3e+38, %v955_v55 }
 0x328   : > { %v1029_v19 = vmin.f32 %v1010_v63, %v1012_v28  ;;  %v1030_v30 = vmin.f32 %v1011_v0, %v1013_v43  ;;  %vm999_vm11 = vcmp.eq.f32.partialorder %v958_v49, %v2765_v62  ;;  %vm1000_vm12 = vcmp.eq.f32.partialorder %v959_v3, %v2765_v62 }
 0x329   : > { %v1015_v31 = vsel %vm997_vm9, 3e+38, %v956_v14  ;;  %v1016_v35 = vsel %vm998_vm7, 3e+38, %v957_v29  ;;  %v1017_v25 = vsel %vm999_vm11, 3e+38, %v958_v49 }
 0x32a   : > { %v1031_v22 = vmin.f32 %v1029_v19, %v1014_v1  ;;  %v1032_v23 = vmin.f32 %v1030_v30, %v1015_v31  ;;  %v1018_v32 = vsel %vm1000_vm12, 3e+38, %v959_v3 }
 0x32c   : > { %v1033_v48 = vmin.f32 %v1031_v22, %v1016_v35  ;;  %v1034_v4 = vmin.f32 %v1032_v23, %v1017_v25 }
 0x32e   : > { %v1035_v5 = vmin.f32 %v1033_v48, %v1018_v32 }
 0x330   : > { %v1036_v7 = vmin.f32 %v1035_v5, %v1034_v4 }
 0x332   : > { %1037 = vmin.xlane.f32.xlu1 %v1036_v7 }
 0x34c   : > { %v2776_v8 = vpop.xlane.xlu0 %968 }
 0x34d   : > { %vm983_vm14 = vcmp.eq.f32.partialorder %v942_v9, %v2776_v8  ;;  %vm984_vm13 = vcmp.eq.f32.partialorder %v943_v40, %v2776_v8  ;;  %vm985_vm15 = vcmp.eq.f32.partialorder %v944_v54, %v2776_v8  ;;  %vm986_vm0 = vcmp.eq.f32.partialorder %v945_v53, %v2776_v8 }
 0x34e   : > { %vm987_vm2 = vcmp.eq.f32.partialorder %v946_v17, %v2776_v8  ;;  %v1001_v20 = vsel %vm983_vm14, 3e+38, %v942_v9  ;;  %v1002_v24 = vsel %vm984_vm13, 3e+38, %v943_v40  ;;  %vm988_vm4 = vcmp.eq.f32.partialorder %v947_v21, %v2776_v8 }
 0x34f   : > { %v1003_v44 = vsel %vm985_vm15, 3e+38, %v944_v54  ;;  %v1004_v46 = vsel %vm986_vm0, 3e+38, %v945_v53  ;;  %vm989_vm6 = vcmp.eq.f32.partialorder %v948_v26, %v2776_v8  ;;  %v1005_v45 = vsel %vm987_vm2, 3e+38, %v946_v17 }
 0x350   : > { %v1019_v36 = vmin.f32 %v1001_v20, %v1003_v44  ;;  %v1020_v38 = vmin.f32 %v1002_v24, %v1004_v46  ;;  %vm990_vm1 = vcmp.eq.f32.partialorder %v949_v51, %v2776_v8  ;;  %vm991_vm3 = vcmp.eq.f32.partialorder %v950_v58, %v2776_v8 }
 0x351   : > { %v1006_v6 = vsel %vm988_vm4, 3e+38, %v947_v21  ;;  %v1007_v16 = vsel %vm989_vm6, 3e+38, %v948_v26  ;;  %v1008_v14 = vsel %vm990_vm1, 3e+38, %v949_v51 }
 0x352   : > { %v1021_v13 = vmin.f32 %v1019_v36, %v1005_v45  ;;  %v1022_v55 = vmin.f32 %v1020_v38, %v1006_v6  ;;  %v1009_v52 = vsel %vm991_vm3, 3e+38, %v950_v58 }
 0x354   : > { %v1023_v57 = vmin.f32 %v1021_v13, %v1007_v16  ;;  %v1024_v29 = vmin.f32 %v1022_v55, %v1008_v14 }
 0x356   : > { %v1025_v39 = vmin.f32 %v1023_v57, %v1009_v52 }
 0x358   : > { %v1026_v10 = vmin.f32 %v1025_v39, %v1024_v29 }
 0x35a   : > { %1027 = vmin.xlane.f32.xlu0 %v1026_v10 }
 0x3bb   : > { %v2787_v49 = vpop.xlane.xlu1 %1037 }
 0x3bc   : > { %vm1051_vm5 = vcmp.eq.f32.partialorder %v1010_v63, %v2787_v49  ;;  %vm1052_vm8 = vcmp.eq.f32.partialorder %v1011_v0, %v2787_v49  ;;  %vm1053_vm10 = vcmp.eq.f32.partialorder %v1012_v28, %v2787_v49  ;;  %vm1054_vm9 = vcmp.eq.f32.partialorder %v1013_v43, %v2787_v49 }
 0x3bd   : > { %vm1055_vm7 = vcmp.eq.f32.partialorder %v1014_v1, %v2787_v49  ;;  %vm1056_vm11 = vcmp.eq.f32.partialorder %v1015_v31, %v2787_v49  ;;  %v1069_v3 = vsel %vm1051_vm5, 3e+38, %v1010_v63  ;;  %v1070_v41 = vsel %vm1052_vm8, 3e+38, %v1011_v0 }
 0x3be   : > { %v1071_v56 = vsel %vm1053_vm10, 3e+38, %v1012_v28  ;;  %vm1057_vm12 = vcmp.eq.f32.partialorder %v1016_v35, %v2787_v49  ;;  %v1072_v34 = vsel %vm1054_vm9, 3e+38, %v1013_v43  ;;  %v1073_v40 = vsel %vm1055_vm7, 3e+38, %v1014_v1 }
 0x3bf   : > { %v1088_v9 = vmin.f32 %v1069_v3, %v1071_v56  ;;  %v1089_v54 = vmin.f32 %v1070_v41, %v1072_v34  ;;  %vm1058_vm14 = vcmp.eq.f32.partialorder %v1017_v25, %v2787_v49  ;;  %vm1059_vm13 = vcmp.eq.f32.partialorder %v1018_v32, %v2787_v49 }
 0x3c0   : > { %v1074_v53 = vsel %vm1056_vm11, 3e+38, %v1015_v31  ;;  %v1075_v17 = vsel %vm1057_vm12, 3e+38, %v1016_v35  ;;  %v1076_v47 = vsel %vm1058_vm14, 3e+38, %v1017_v25 }
 0x3c1   : > { %v1090_v2 = vmin.f32 %v1088_v9, %v1073_v40  ;;  %v1091_v27 = vmin.f32 %v1089_v54, %v1074_v53  ;;  %v1077_v26 = vsel %vm1059_vm13, 3e+38, %v1018_v32 }
 0x3c3   : > { %v1092_v21 = vmin.f32 %v1090_v2, %v1075_v17  ;;  %v1093_v50 = vmin.f32 %v1091_v27, %v1076_v47 }
 0x3c5   : > { %v1094_v42 = vmin.f32 %v1092_v21, %v1077_v26 }
 0x3c7   : > { %v1095_v51 = vmin.f32 %v1094_v42, %v1093_v50 }
 0x3c9   : > { %1096 = vmin.xlane.f32.xlu1 %v1095_v51 }
 0x3e3   : > { %v2798_v58 = vpop.xlane.xlu0 %1027 }
 0x3e4   : > { %vm1042_vm15 = vcmp.eq.f32.partialorder %v1001_v20, %v2798_v58  ;;  %vm1043_vm0 = vcmp.eq.f32.partialorder %v1002_v24, %v2798_v58  ;;  %vm1044_vm2 = vcmp.eq.f32.partialorder %v1003_v44, %v2798_v58  ;;  %vm1045_vm4 = vcmp.eq.f32.partialorder %v1004_v46, %v2798_v58 }
 0x3e5   : > { %vm1046_vm6 = vcmp.eq.f32.partialorder %v1005_v45, %v2798_v58  ;;  %vm1047_vm1 = vcmp.eq.f32.partialorder %v1006_v6, %v2798_v58  ;;  %v1060_v59 = vsel %vm1042_vm15, 3e+38, %v1001_v20  ;;  %v1061_v60 = vsel %vm1043_vm0, 3e+38, %v1002_v24 }
 0x3e6   : > { %v1062_v61 = vsel %vm1044_vm2, 3e+38, %v1003_v44  ;;  %vm1048_vm3 = vcmp.eq.f32.partialorder %v1007_v16, %v2798_v58  ;;  %v1063_v63 = vsel %vm1045_vm4, 3e+38, %v1004_v46  ;;  %v1064_v28 = vsel %vm1046_vm6, 3e+38, %v1005_v45 }
 0x3e7   : > { %v1078_v0 = vmin.f32 %v1060_v59, %v1062_v61  ;;  %v1079_v43 = vmin.f32 %v1061_v60, %v1063_v63  ;;  %vm1049_vm5 = vcmp.eq.f32.partialorder %v1008_v14, %v2798_v58  ;;  %vm1050_vm8 = vcmp.eq.f32.partialorder %v1009_v52, %v2798_v58 }
 0x3e8   : > { %v1065_v19 = vsel %vm1047_vm1, 3e+38, %v1006_v6  ;;  %v1066_v30 = vsel %vm1048_vm3, 3e+38, %v1007_v16  ;;  %v1067_v35 = vsel %vm1049_vm5, 3e+38, %v1008_v14 }
 0x3e9   : > { %v1080_v1 = vmin.f32 %v1078_v0, %v1064_v28  ;;  %v1081_v31 = vmin.f32 %v1079_v43, %v1065_v19  ;;  %v1068_v23 = vsel %vm1050_vm8, 3e+38, %v1009_v52 }
 0x3eb   : > { %v1082_v22 = vmin.f32 %v1080_v1, %v1066_v30  ;;  %v1083_v48 = vmin.f32 %v1081_v31, %v1067_v35 }
 0x3ed   : > { %v1084_v25 = vmin.f32 %v1082_v22, %v1068_v23 }
 0x3ef   : > { %v1085_v32 = vmin.f32 %v1084_v25, %v1083_v48 }
 0x3f1   : > { %1086 = vmin.xlane.f32.xlu0 %v1085_v32 }
 0x452   : > { %v2809_v4 = vpop.xlane.xlu1 %1096 }
 0x453   : > { %vm1110_vm10 = vcmp.eq.f32.partialorder %v1069_v3, %v2809_v4  ;;  %vm1111_vm9 = vcmp.eq.f32.partialorder %v1070_v41, %v2809_v4  ;;  %vm1112_vm7 = vcmp.eq.f32.partialorder %v1071_v56, %v2809_v4  ;;  %vm1113_vm11 = vcmp.eq.f32.partialorder %v1072_v34, %v2809_v4 }
 0x454   : > { %vm1114_vm12 = vcmp.eq.f32.partialorder %v1073_v40, %v2809_v4  ;;  %vm1115_vm14 = vcmp.eq.f32.partialorder %v1074_v53, %v2809_v4  ;;  %v1128_v5 = vsel %vm1110_vm10, 3e+38, %v1069_v3  ;;  %v1129_v7 = vsel %vm1111_vm9, 3e+38, %v1070_v41 }
 0x455   : > { %v1130_v20 = vsel %vm1112_vm7, 3e+38, %v1071_v56  ;;  %vm1116_vm13 = vcmp.eq.f32.partialorder %v1075_v17, %v2809_v4  ;;  %v1131_v24 = vsel %vm1113_vm11, 3e+38, %v1072_v34  ;;  %v1132_v46 = vsel %vm1114_vm12, 3e+38, %v1073_v40 }
 0x456   : > { %v1147_v44 = vmin.f32 %v1128_v5, %v1130_v20  ;;  %v1148_v36 = vmin.f32 %v1129_v7, %v1131_v24  ;;  %vm1117_vm15 = vcmp.eq.f32.partialorder %v1076_v47, %v2809_v4  ;;  %vm1118_vm0 = vcmp.eq.f32.partialorder %v1077_v26, %v2809_v4 }
 0x457   : > { %v1133_v45 = vsel %vm1115_vm14, 3e+38, %v1074_v53  ;;  %v1134_v6 = vsel %vm1116_vm13, 3e+38, %v1075_v17  ;;  %v1135_v55 = vsel %vm1117_vm15, 3e+38, %v1076_v47 }
 0x458   : > { %v1149_v38 = vmin.f32 %v1147_v44, %v1132_v46  ;;  %v1150_v13 = vmin.f32 %v1148_v36, %v1133_v45  ;;  %v1136_v57 = vsel %vm1118_vm0, 3e+38, %v1077_v26 }
 0x45a   : > { %v1151_v16 = vmin.f32 %v1149_v38, %v1134_v6  ;;  %v1152_v14 = vmin.f32 %v1150_v13, %v1135_v55 }
 0x45c   : > { %v1153_v52 = vmin.f32 %v1151_v16, %v1136_v57 }
 0x45e   : > { %v1154_v29 = vmin.f32 %v1153_v52, %v1152_v14 }
 0x460   : > { %1155 = vmin.xlane.f32.xlu1 %v1154_v29 }
 0x47a   : > { %v2820_v39 = vpop.xlane.xlu0 %1086 }
 0x47b   : > { %vm1101_vm2 = vcmp.eq.f32.partialorder %v1060_v59, %v2820_v39  ;;  %vm1102_vm4 = vcmp.eq.f32.partialorder %v1061_v60, %v2820_v39  ;;  %vm1103_vm6 = vcmp.eq.f32.partialorder %v1062_v61, %v2820_v39  ;;  %vm1104_vm1 = vcmp.eq.f32.partialorder %v1063_v63, %v2820_v39 }
 0x47c   : > { %vm1105_vm3 = vcmp.eq.f32.partialorder %v1064_v28, %v2820_v39  ;;  %vm1106_vm5 = vcmp.eq.f32.partialorder %v1065_v19, %v2820_v39  ;;  %v1119_v10 = vsel %vm1101_vm2, 3e+38, %v1060_v59  ;;  %v1120_v3 = vsel %vm1102_vm4, 3e+38, %v1061_v60 }
 0x47d   : > { %v1121_v41 = vsel %vm1103_vm6, 3e+38, %v1062_v61  ;;  %vm1107_vm8 = vcmp.eq.f32.partialorder %v1066_v30, %v2820_v39  ;;  %v1122_v56 = vsel %vm1104_vm1, 3e+38, %v1063_v63  ;;  %v1123_v9 = vsel %vm1105_vm3, 3e+38, %v1064_v28 }
 0x47e   : > { %v1137_v34 = vmin.f32 %v1119_v10, %v1121_v41  ;;  %v1138_v40 = vmin.f32 %v1120_v3, %v1122_v56  ;;  %vm1108_vm10 = vcmp.eq.f32.partialorder %v1067_v35, %v2820_v39  ;;  %vm1109_vm9 = vcmp.eq.f32.partialorder %v1068_v23, %v2820_v39 }
 0x47f   : > { %v1124_v54 = vsel %vm1106_vm5, 3e+38, %v1065_v19  ;;  %v1125_v2 = vsel %vm1107_vm8, 3e+38, %v1066_v30  ;;  %v1126_v21 = vsel %vm1108_vm10, 3e+38, %v1067_v35 }
 0x480   : > { %v1139_v53 = vmin.f32 %v1137_v34, %v1123_v9  ;;  %v1140_v17 = vmin.f32 %v1138_v40, %v1124_v54  ;;  %v1127_v47 = vsel %vm1109_vm9, 3e+38, %v1068_v23 }
 0x482   : > { %v1141_v27 = vmin.f32 %v1139_v53, %v1125_v2  ;;  %v1142_v26 = vmin.f32 %v1140_v17, %v1126_v21 }
 0x484   : > { %v1143_v50 = vmin.f32 %v1141_v27, %v1127_v47 }
 0x486   : > { %v1144_v42 = vmin.f32 %v1143_v50, %v1142_v26 }
 0x488   : > { %1145 = vmin.xlane.f32.xlu0 %v1144_v42 }
 0x4e9   : > { %v2831_v51 = vpop.xlane.xlu1 %1155 }
 0x4ea   : > { %vm1169_vm7 = vcmp.eq.f32.partialorder %v1128_v5, %v2831_v51  ;;  %vm1170_vm11 = vcmp.eq.f32.partialorder %v1129_v7, %v2831_v51  ;;  %vm1171_vm12 = vcmp.eq.f32.partialorder %v1130_v20, %v2831_v51  ;;  %vm1172_vm14 = vcmp.eq.f32.partialorder %v1131_v24, %v2831_v51 }
 0x4eb   : > { %vm1173_vm13 = vcmp.eq.f32.partialorder %v1132_v46, %v2831_v51  ;;  %vm1174_vm15 = vcmp.eq.f32.partialorder %v1133_v45, %v2831_v51  ;;  %v1187_v59 = vsel %vm1169_vm7, 3e+38, %v1128_v5  ;;  %v1188_v60 = vsel %vm1170_vm11, 3e+38, %v1129_v7 }
 0x4ec   : > { %v1189_v61 = vsel %vm1171_vm12, 3e+38, %v1130_v20  ;;  %vm1175_vm0 = vcmp.eq.f32.partialorder %v1134_v6, %v2831_v51  ;;  %v1190_v63 = vsel %vm1172_vm14, 3e+38, %v1131_v24  ;;  %v1191_v28 = vsel %vm1173_vm13, 3e+38, %v1132_v46 }
 0x4ed   : > { %v1206_v0 = vmin.f32 %v1187_v59, %v1189_v61  ;;  %v1207_v43 = vmin.f32 %v1188_v60, %v1190_v63  ;;  %vm1176_vm2 = vcmp.eq.f32.partialorder %v1135_v55, %v2831_v51  ;;  %vm1177_vm4 = vcmp.eq.f32.partialorder %v1136_v57, %v2831_v51 }
 0x4ee   : > { %v1192_v19 = vsel %vm1174_vm15, 3e+38, %v1133_v45  ;;  %v1193_v30 = vsel %vm1175_vm0, 3e+38, %v1134_v6  ;;  %v1194_v35 = vsel %vm1176_vm2, 3e+38, %v1135_v55 }
 0x4ef   : > { %v1208_v1 = vmin.f32 %v1206_v0, %v1191_v28  ;;  %v1209_v31 = vmin.f32 %v1207_v43, %v1192_v19  ;;  %v1195_v23 = vsel %vm1177_vm4, 3e+38, %v1136_v57 }
 0x4f1   : > { %v1210_v22 = vmin.f32 %v1208_v1, %v1193_v30  ;;  %v1211_v48 = vmin.f32 %v1209_v31, %v1194_v35 }
 0x4f3   : > { %v1212_v25 = vmin.f32 %v1210_v22, %v1195_v23 }
 0x4f5   : > { %v1213_v32 = vmin.f32 %v1212_v25, %v1211_v48 }
 0x4f7   : > { %1214 = vmin.xlane.f32.xlu1 %v1213_v32 }
 0x511   : > { %v2842_v5 = vpop.xlane.xlu0 %1145 }
 0x512   : > { %vm1160_vm6 = vcmp.eq.f32.partialorder %v1119_v10, %v2842_v5  ;;  %vm1161_vm1 = vcmp.eq.f32.partialorder %v1120_v3, %v2842_v5  ;;  %vm1162_vm3 = vcmp.eq.f32.partialorder %v1121_v41, %v2842_v5  ;;  %vm1163_vm5 = vcmp.eq.f32.partialorder %v1122_v56, %v2842_v5 }
 0x513   : > { %vm1164_vm8 = vcmp.eq.f32.partialorder %v1123_v9, %v2842_v5  ;;  %vm1165_vm10 = vcmp.eq.f32.partialorder %v1124_v54, %v2842_v5  ;;  %v1178_v7 = vsel %vm1160_vm6, 3e+38, %v1119_v10  ;;  %v1179_v20 = vsel %vm1161_vm1, 3e+38, %v1120_v3 }
 0x514   : > { %v1180_v24 = vsel %vm1162_vm3, 3e+38, %v1121_v41  ;;  %vm1166_vm9 = vcmp.eq.f32.partialorder %v1125_v2, %v2842_v5  ;;  %v1181_v44 = vsel %vm1163_vm5, 3e+38, %v1122_v56  ;;  %v1182_v36 = vsel %vm1164_vm8, 3e+38, %v1123_v9 }
 0x515   : > { %v1196_v46 = vmin.f32 %v1178_v7, %v1180_v24  ;;  %v1197_v45 = vmin.f32 %v1179_v20, %v1181_v44  ;;  %vm1167_vm7 = vcmp.eq.f32.partialorder %v1126_v21, %v2842_v5  ;;  %vm1168_vm11 = vcmp.eq.f32.partialorder %v1127_v47, %v2842_v5 }
 0x516   : > { %v1183_v38 = vsel %vm1165_vm10, 3e+38, %v1124_v54  ;;  %v1184_v13 = vsel %vm1166_vm9, 3e+38, %v1125_v2  ;;  %v1185_v57 = vsel %vm1167_vm7, 3e+38, %v1126_v21 }
 0x517   : > { %v1198_v6 = vmin.f32 %v1196_v46, %v1182_v36  ;;  %v1199_v16 = vmin.f32 %v1197_v45, %v1183_v38  ;;  %v1186_v14 = vsel %vm1168_vm11, 3e+38, %v1127_v47 }
 0x519   : > { %v1200_v55 = vmin.f32 %v1198_v6, %v1184_v13  ;;  %v1201_v52 = vmin.f32 %v1199_v16, %v1185_v57 }
 0x51b   : > { %v1202_v29 = vmin.f32 %v1200_v55, %v1186_v14 }
 0x51d   : > { %v1203_v10 = vmin.f32 %v1202_v29, %v1201_v52 }
 0x51f   : > { %1204 = vmin.xlane.f32.xlu0 %v1203_v10 }
 0x580   : > { %v2853_v3 = vpop.xlane.xlu1 %1214 }
 0x581   : > { %vm1228_vm12 = vcmp.eq.f32.partialorder %v1187_v59, %v2853_v3  ;;  %vm1229_vm14 = vcmp.eq.f32.partialorder %v1188_v60, %v2853_v3  ;;  %vm1230_vm13 = vcmp.eq.f32.partialorder %v1189_v61, %v2853_v3  ;;  %vm1231_vm15 = vcmp.eq.f32.partialorder %v1190_v63, %v2853_v3 }
 0x582   : > { %vm1232_vm0 = vcmp.eq.f32.partialorder %v1191_v28, %v2853_v3  ;;  %vm1233_vm2 = vcmp.eq.f32.partialorder %v1192_v19, %v2853_v3  ;;  %v1246_v41 = vsel %vm1228_vm12, 3e+38, %v1187_v59  ;;  %v1247_v56 = vsel %vm1229_vm14, 3e+38, %v1188_v60 }
 0x583   : > { %v1248_v34 = vsel %vm1230_vm13, 3e+38, %v1189_v61  ;;  %vm1234_vm4 = vcmp.eq.f32.partialorder %v1193_v30, %v2853_v3  ;;  %v1249_v9 = vsel %vm1231_vm15, 3e+38, %v1190_v63  ;;  %v1250_v54 = vsel %vm1232_vm0, 3e+38, %v1191_v28 }
 0x584   : > { %v1265_v40 = vmin.f32 %v1246_v41, %v1248_v34  ;;  %v1266_v53 = vmin.f32 %v1247_v56, %v1249_v9  ;;  %vm1235_vm6 = vcmp.eq.f32.partialorder %v1194_v35, %v2853_v3  ;;  %vm1236_vm1 = vcmp.eq.f32.partialorder %v1195_v23, %v2853_v3 }
 0x585   : > { %v1251_v2 = vsel %vm1233_vm2, 3e+38, %v1192_v19  ;;  %v1252_v27 = vsel %vm1234_vm4, 3e+38, %v1193_v30  ;;  %v1253_v26 = vsel %vm1235_vm6, 3e+38, %v1194_v35 }
 0x586   : > { %v1267_v17 = vmin.f32 %v1265_v40, %v1250_v54  ;;  %v1268_v21 = vmin.f32 %v1266_v53, %v1251_v2  ;;  %v1254_v50 = vsel %vm1236_vm1, 3e+38, %v1195_v23 }
 0x588   : > { %v1269_v47 = vmin.f32 %v1267_v17, %v1252_v27  ;;  %v1270_v42 = vmin.f32 %v1268_v21, %v1253_v26 }
 0x58a   : > { %v1271_v59 = vmin.f32 %v1269_v47, %v1254_v50 }
 0x58c   : > { %v1272_v60 = vmin.f32 %v1271_v59, %v1270_v42 }
 0x58e   : > { %1273 = vmin.xlane.f32.xlu1 %v1272_v60 }
 0x5a8   : > { %v2864_v61 = vpop.xlane.xlu0 %1204 }
 0x5a9   : > { %vm1219_vm3 = vcmp.eq.f32.partialorder %v1178_v7, %v2864_v61  ;;  %vm1220_vm5 = vcmp.eq.f32.partialorder %v1179_v20, %v2864_v61  ;;  %vm1221_vm8 = vcmp.eq.f32.partialorder %v1180_v24, %v2864_v61  ;;  %vm1222_vm10 = vcmp.eq.f32.partialorder %v1181_v44, %v2864_v61 }
 0x5aa   : > { %vm1223_vm9 = vcmp.eq.f32.partialorder %v1182_v36, %v2864_v61  ;;  %vm1224_vm7 = vcmp.eq.f32.partialorder %v1183_v38, %v2864_v61  ;;  %v1237_v63 = vsel %vm1219_vm3, 3e+38, %v1178_v7  ;;  %v1238_v0 = vsel %vm1220_vm5, 3e+38, %v1179_v20 }
 0x5ab   : > { %v1239_v28 = vsel %vm1221_vm8, 3e+38, %v1180_v24  ;;  %vm1225_vm11 = vcmp.eq.f32.partialorder %v1184_v13, %v2864_v61  ;;  %v1240_v43 = vsel %vm1222_vm10, 3e+38, %v1181_v44  ;;  %v1241_v1 = vsel %vm1223_vm9, 3e+38, %v1182_v36 }
 0x5ac   : > { %v1255_v19 = vmin.f32 %v1237_v63, %v1239_v28  ;;  %v1256_v30 = vmin.f32 %v1238_v0, %v1240_v43  ;;  %vm1226_vm12 = vcmp.eq.f32.partialorder %v1185_v57, %v2864_v61  ;;  %vm1227_vm14 = vcmp.eq.f32.partialorder %v1186_v14, %v2864_v61 }
 0x5ad   : > { %v1242_v31 = vsel %vm1224_vm7, 3e+38, %v1183_v38  ;;  %v1243_v35 = vsel %vm1225_vm11, 3e+38, %v1184_v13  ;;  %v1244_v25 = vsel %vm1226_vm12, 3e+38, %v1185_v57 }
 0x5ae   : > { %v1257_v22 = vmin.f32 %v1255_v19, %v1241_v1  ;;  %v1258_v23 = vmin.f32 %v1256_v30, %v1242_v31  ;;  %v1245_v32 = vsel %vm1227_vm14, 3e+38, %v1186_v14 }
 0x5b0   : > { %v1259_v48 = vmin.f32 %v1257_v22, %v1243_v35  ;;  %v1260_v7 = vmin.f32 %v1258_v23, %v1244_v25 }
 0x5b2   : > { %v1261_v20 = vmin.f32 %v1259_v48, %v1245_v32 }
 0x5b4   : > { %v1262_v24 = vmin.f32 %v1261_v20, %v1260_v7 }
 0x5b6   : > { %1263 = vmin.xlane.f32.xlu0 %v1262_v24 }
 0x617   : > { %v2875_v46 = vpop.xlane.xlu1 %1273 }
 0x618   : > { %vm1287_vm13 = vcmp.eq.f32.partialorder %v1246_v41, %v2875_v46  ;;  %vm1288_vm15 = vcmp.eq.f32.partialorder %v1247_v56, %v2875_v46  ;;  %vm1289_vm0 = vcmp.eq.f32.partialorder %v1248_v34, %v2875_v46  ;;  %vm1290_vm2 = vcmp.eq.f32.partialorder %v1249_v9, %v2875_v46 }
 0x619   : > { %vm1291_vm4 = vcmp.eq.f32.partialorder %v1250_v54, %v2875_v46  ;;  %vm1292_vm6 = vcmp.eq.f32.partialorder %v1251_v2, %v2875_v46  ;;  %v1305_v44 = vsel %vm1287_vm13, 3e+38, %v1246_v41  ;;  %v1306_v36 = vsel %vm1288_vm15, 3e+38, %v1247_v56 }
 0x61a   : > { %v1307_v45 = vsel %vm1289_vm0, 3e+38, %v1248_v34  ;;  %vm1293_vm1 = vcmp.eq.f32.partialorder %v1252_v27, %v2875_v46  ;;  %v1308_v38 = vsel %vm1290_vm2, 3e+38, %v1249_v9  ;;  %v1309_v13 = vsel %vm1291_vm4, 3e+38, %v1250_v54 }
 0x61b   : > { %v1324_v6 = vmin.f32 %v1305_v44, %v1307_v45  ;;  %v1325_v16 = vmin.f32 %v1306_v36, %v1308_v38  ;;  %vm1294_vm3 = vcmp.eq.f32.partialorder %v1253_v26, %v2875_v46  ;;  %vm1295_vm5 = vcmp.eq.f32.partialorder %v1254_v50, %v2875_v46 }
 0x61c   : > { %v1310_v55 = vsel %vm1292_vm6, 3e+38, %v1251_v2  ;;  %v1311_v14 = vsel %vm1293_vm1, 3e+38, %v1252_v27  ;;  %v1312_v10 = vsel %vm1294_vm3, 3e+38, %v1253_v26 }
 0x61d   : > { %v1326_v57 = vmin.f32 %v1324_v6, %v1309_v13  ;;  %v1327_v52 = vmin.f32 %v1325_v16, %v1310_v55  ;;  %v1313_v40 = vsel %vm1295_vm5, 3e+38, %v1254_v50 }
 0x61f   : > { %v1328_v29 = vmin.f32 %v1326_v57, %v1311_v14  ;;  %v1329_v41 = vmin.f32 %v1327_v52, %v1312_v10 }
 0x621   : > { %v1330_v56 = vmin.f32 %v1328_v29, %v1313_v40 }
 0x623   : > { %v1331_v34 = vmin.f32 %v1330_v56, %v1329_v41 }
 0x625   : > { %1332 = vmin.xlane.f32.xlu1 %v1331_v34 }
 0x63f   : > { %v2886_v53 = vpop.xlane.xlu0 %1263 }
 0x640   : > { %vm1278_vm8 = vcmp.eq.f32.partialorder %v1237_v63, %v2886_v53  ;;  %vm1279_vm10 = vcmp.eq.f32.partialorder %v1238_v0, %v2886_v53  ;;  %vm1280_vm9 = vcmp.eq.f32.partialorder %v1239_v28, %v2886_v53  ;;  %vm1281_vm7 = vcmp.eq.f32.partialorder %v1240_v43, %v2886_v53 }
 0x641   : > { %vm1282_vm11 = vcmp.eq.f32.partialorder %v1241_v1, %v2886_v53  ;;  %vm1283_vm12 = vcmp.eq.f32.partialorder %v1242_v31, %v2886_v53  ;;  %v1296_v9 = vsel %vm1278_vm8, 3e+38, %v1237_v63  ;;  %v1297_v54 = vsel %vm1279_vm10, 3e+38, %v1238_v0 }
 0x642   : > { %v1298_v2 = vsel %vm1280_vm9, 3e+38, %v1239_v28  ;;  %vm1284_vm14 = vcmp.eq.f32.partialorder %v1243_v35, %v2886_v53  ;;  %v1299_v17 = vsel %vm1281_vm7, 3e+38, %v1240_v43  ;;  %v1300_v21 = vsel %vm1282_vm11, 3e+38, %v1241_v1 }
 0x643   : > { %v1314_v27 = vmin.f32 %v1296_v9, %v1298_v2  ;;  %v1315_v47 = vmin.f32 %v1297_v54, %v1299_v17  ;;  %vm1285_vm13 = vcmp.eq.f32.partialorder %v1244_v25, %v2886_v53  ;;  %vm1286_vm15 = vcmp.eq.f32.partialorder %v1245_v32, %v2886_v53 }
 0x644   : > { %v1301_v26 = vsel %vm1283_vm12, 3e+38, %v1242_v31  ;;  %v1302_v42 = vsel %vm1284_vm14, 3e+38, %v1243_v35  ;;  %v1303_v19 = vsel %vm1285_vm13, 3e+38, %v1244_v25 }
 0x645   : > { %v1316_v50 = vmin.f32 %v1314_v27, %v1300_v21  ;;  %v1317_v59 = vmin.f32 %v1315_v47, %v1301_v26  ;;  %v1304_v30 = vsel %vm1286_vm15, 3e+38, %v1245_v32 }
 0x647   : > { %v1318_v60 = vmin.f32 %v1316_v50, %v1302_v42  ;;  %v1319_v63 = vmin.f32 %v1317_v59, %v1303_v19 }
 0x649   : > { %v1320_v0 = vmin.f32 %v1318_v60, %v1304_v30 }
 0x64b   : > { %v1321_v28 = vmin.f32 %v1320_v0, %v1319_v63 }
 0x64d   : > { %1322 = vmin.xlane.f32.xlu0 %v1321_v28 }
 0x6ae   : > { %v2897_v22 = vpop.xlane.xlu1 %1332 }
 0x6af   : > { %vm1346_vm0 = vcmp.eq.f32.partialorder %v1305_v44, %v2897_v22  ;;  %vm1347_vm2 = vcmp.eq.f32.partialorder %v1306_v36, %v2897_v22  ;;  %vm1348_vm4 = vcmp.eq.f32.partialorder %v1307_v45, %v2897_v22  ;;  %vm1349_vm6 = vcmp.eq.f32.partialorder %v1308_v38, %v2897_v22 }
 0x6b0   : > { %vm1350_vm1 = vcmp.eq.f32.partialorder %v1309_v13, %v2897_v22  ;;  %vm1351_vm3 = vcmp.eq.f32.partialorder %v1310_v55, %v2897_v22  ;;  %v1364_v43 = vsel %vm1346_vm0, 3e+38, %v1305_v44  ;;  %v1365_v1 = vsel %vm1347_vm2, 3e+38, %v1306_v36 }
 0x6b1   : > { %v1366_v31 = vsel %vm1348_vm4, 3e+38, %v1307_v45  ;;  %vm1352_vm5 = vcmp.eq.f32.partialorder %v1311_v14, %v2897_v22  ;;  %v1367_v35 = vsel %vm1349_vm6, 3e+38, %v1308_v38  ;;  %v1368_v48 = vsel %vm1350_vm1, 3e+38, %v1309_v13 }
 0x6b2   : > { %v1383_v23 = vmin.f32 %v1364_v43, %v1366_v31  ;;  %v1384_v25 = vmin.f32 %v1365_v1, %v1367_v35  ;;  %vm1353_vm8 = vcmp.eq.f32.partialorder %v1312_v10, %v2897_v22  ;;  %vm1354_vm10 = vcmp.eq.f32.partialorder %v1313_v40, %v2897_v22 }
 0x6b3   : > { %v1369_v32 = vsel %vm1351_vm3, 3e+38, %v1310_v55  ;;  %v1370_v20 = vsel %vm1352_vm5, 3e+38, %v1311_v14  ;;  %v1371_v16 = vsel %vm1353_vm8, 3e+38, %v1312_v10 }
 0x6b4   : > { %v1385_v7 = vmin.f32 %v1383_v23, %v1368_v48  ;;  %v1386_v24 = vmin.f32 %v1384_v25, %v1369_v32  ;;  %v1372_v57 = vsel %vm1354_vm10, 3e+38, %v1313_v40 }
 0x6b6   : > { %v1387_v6 = vmin.f32 %v1385_v7, %v1370_v20  ;;  %v1388_v44 = vmin.f32 %v1386_v24, %v1371_v16 }
 0x6b8   : > { %v1389_v36 = vmin.f32 %v1387_v6, %v1372_v57 }
 0x6ba   : > { %v1390_v45 = vmin.f32 %v1389_v36, %v1388_v44 }
 0x6bc   : > { %1391 = vmin.xlane.f32.xlu1 %v1390_v45 }
 0x6d6   : > { %v2908_v52 = vpop.xlane.xlu0 %1322 }
 0x6d7   : > { %vm1337_vm9 = vcmp.eq.f32.partialorder %v1296_v9, %v2908_v52  ;;  %vm1338_vm7 = vcmp.eq.f32.partialorder %v1297_v54, %v2908_v52  ;;  %vm1339_vm11 = vcmp.eq.f32.partialorder %v1298_v2, %v2908_v52  ;;  %vm1340_vm12 = vcmp.eq.f32.partialorder %v1299_v17, %v2908_v52 }
 0x6d8   : > { %vm1341_vm14 = vcmp.eq.f32.partialorder %v1300_v21, %v2908_v52  ;;  %vm1342_vm13 = vcmp.eq.f32.partialorder %v1301_v26, %v2908_v52  ;;  %v1355_v38 = vsel %vm1337_vm9, 3e+38, %v1296_v9  ;;  %v1356_v13 = vsel %vm1338_vm7, 3e+38, %v1297_v54 }
 0x6d9   : > { %v1357_v55 = vsel %vm1339_vm11, 3e+38, %v1298_v2  ;;  %vm1343_vm15 = vcmp.eq.f32.partialorder %v1302_v42, %v2908_v52  ;;  %v1358_v14 = vsel %vm1340_vm12, 3e+38, %v1299_v17  ;;  %v1359_v10 = vsel %vm1341_vm14, 3e+38, %v1300_v21 }
 0x6da   : > { %v1373_v29 = vmin.f32 %v1355_v38, %v1357_v55  ;;  %v1374_v40 = vmin.f32 %v1356_v13, %v1358_v14  ;;  %vm1344_vm0 = vcmp.eq.f32.partialorder %v1303_v19, %v2908_v52  ;;  %vm1345_vm2 = vcmp.eq.f32.partialorder %v1304_v30, %v2908_v52 }
 0x6db   : > { %v1360_v41 = vsel %vm1342_vm13, 3e+38, %v1301_v26  ;;  %v1361_v34 = vsel %vm1343_vm15, 3e+38, %v1302_v42  ;;  %v1362_v50 = vsel %vm1344_vm0, 3e+38, %v1303_v19 }
 0x6dc   : > { %v1375_v56 = vmin.f32 %v1373_v29, %v1359_v10  ;;  %v1376_v27 = vmin.f32 %v1374_v40, %v1360_v41  ;;  %v1363_v59 = vsel %vm1345_vm2, 3e+38, %v1304_v30 }
 0x6de   : > { %v1377_v47 = vmin.f32 %v1375_v56, %v1361_v34  ;;  %v1378_v9 = vmin.f32 %v1376_v27, %v1362_v50 }
 0x6e0   : > { %v1379_v54 = vmin.f32 %v1377_v47, %v1363_v59 }
 0x6e2   : > { %v1380_v2 = vmin.f32 %v1379_v54, %v1378_v9 }
 0x6e4   : > { %1381 = vmin.xlane.f32.xlu0 %v1380_v2 }
 0x745   : > { %v2919_v60 = vpop.xlane.xlu1 %1391 }
 0x746   : > { %vm1405_vm4 = vcmp.eq.f32.partialorder %v1364_v43, %v2919_v60  ;;  %vm1406_vm6 = vcmp.eq.f32.partialorder %v1365_v1, %v2919_v60  ;;  %vm1407_vm1 = vcmp.eq.f32.partialorder %v1366_v31, %v2919_v60  ;;  %vm1408_vm3 = vcmp.eq.f32.partialorder %v1367_v35, %v2919_v60 }
 0x747   : > { %vm1409_vm5 = vcmp.eq.f32.partialorder %v1368_v48, %v2919_v60  ;;  %vm1410_vm8 = vcmp.eq.f32.partialorder %v1369_v32, %v2919_v60  ;;  %v1423_v17 = vsel %vm1405_vm4, 3e+38, %v1364_v43  ;;  %v1424_v21 = vsel %vm1406_vm6, 3e+38, %v1365_v1 }
 0x748   : > { %v1425_v26 = vsel %vm1407_vm1, 3e+38, %v1366_v31  ;;  %vm1411_vm10 = vcmp.eq.f32.partialorder %v1370_v20, %v2919_v60  ;;  %v1426_v42 = vsel %vm1408_vm3, 3e+38, %v1367_v35  ;;  %v1427_v30 = vsel %vm1409_vm5, 3e+38, %v1368_v48 }
 0x749   : > { %v1442_v19 = vmin.f32 %v1423_v17, %v1425_v26  ;;  %v1443_v63 = vmin.f32 %v1424_v21, %v1426_v42  ;;  %vm1412_vm9 = vcmp.eq.f32.partialorder %v1371_v16, %v2919_v60  ;;  %vm1413_vm7 = vcmp.eq.f32.partialorder %v1372_v57, %v2919_v60 }
 0x74a   : > { %v1428_v0 = vsel %vm1410_vm8, 3e+38, %v1369_v32  ;;  %v1429_v23 = vsel %vm1411_vm10, 3e+38, %v1370_v20  ;;  %v1430_v24 = vsel %vm1412_vm9, 3e+38, %v1371_v16 }
 0x74b   : > { %v1444_v28 = vmin.f32 %v1442_v19, %v1427_v30  ;;  %v1445_v25 = vmin.f32 %v1443_v63, %v1428_v0  ;;  %v1431_v6 = vsel %vm1413_vm7, 3e+38, %v1372_v57 }
 0x74d   : > { %v1446_v7 = vmin.f32 %v1444_v28, %v1429_v23  ;;  %v1447_v43 = vmin.f32 %v1445_v25, %v1430_v24 }
 0x74f   : > { %v1448_v1 = vmin.f32 %v1446_v7, %v1431_v6 }
 0x751   : > { %v1449_v31 = vmin.f32 %v1448_v1, %v1447_v43 }
 0x753   : > { %1450 = vmin.xlane.f32.xlu1 %v1449_v31 }
 0x76d   : > { %v2930_v44 = vpop.xlane.xlu0 %1381 }
 0x76e   : > { %vm1396_vm11 = vcmp.eq.f32.partialorder %v1355_v38, %v2930_v44  ;;  %vm1397_vm12 = vcmp.eq.f32.partialorder %v1356_v13, %v2930_v44  ;;  %vm1398_vm14 = vcmp.eq.f32.partialorder %v1357_v55, %v2930_v44  ;;  %vm1399_vm13 = vcmp.eq.f32.partialorder %v1358_v14, %v2930_v44 }
 0x76f   : > { %vm1400_vm15 = vcmp.eq.f32.partialorder %v1359_v10, %v2930_v44  ;;  %vm1401_vm0 = vcmp.eq.f32.partialorder %v1360_v41, %v2930_v44  ;;  %v1414_v35 = vsel %vm1396_vm11, 3e+38, %v1355_v38  ;;  %v1415_v48 = vsel %vm1397_vm12, 3e+38, %v1356_v13 }
 0x770   : > { %v1416_v32 = vsel %vm1398_vm14, 3e+38, %v1357_v55  ;;  %vm1402_vm2 = vcmp.eq.f32.partialorder %v1361_v34, %v2930_v44  ;;  %v1417_v20 = vsel %vm1399_vm13, 3e+38, %v1358_v14  ;;  %v1418_v57 = vsel %vm1400_vm15, 3e+38, %v1359_v10 }
 0x771   : > { %v1432_v16 = vmin.f32 %v1414_v35, %v1416_v32  ;;  %v1433_v36 = vmin.f32 %v1415_v48, %v1417_v20  ;;  %vm1403_vm4 = vcmp.eq.f32.partialorder %v1362_v50, %v2930_v44  ;;  %vm1404_vm6 = vcmp.eq.f32.partialorder %v1363_v59, %v2930_v44 }
 0x772   : > { %v1419_v45 = vsel %vm1401_vm0, 3e+38, %v1360_v41  ;;  %v1420_v40 = vsel %vm1402_vm2, 3e+38, %v1361_v34  ;;  %v1421_v47 = vsel %vm1403_vm4, 3e+38, %v1362_v50 }
 0x773   : > { %v1434_v29 = vmin.f32 %v1432_v16, %v1418_v57  ;;  %v1435_v56 = vmin.f32 %v1433_v36, %v1419_v45  ;;  %v1422_v9 = vsel %vm1404_vm6, 3e+38, %v1363_v59 }
 0x775   : > { %v1436_v27 = vmin.f32 %v1434_v29, %v1420_v40  ;;  %v1437_v38 = vmin.f32 %v1435_v56, %v1421_v47 }
 0x777   : > { %v1438_v13 = vmin.f32 %v1436_v27, %v1422_v9 }
 0x779   : > { %v1439_v55 = vmin.f32 %v1438_v13, %v1437_v38 }
 0x77b   : > { %1440 = vmin.xlane.f32.xlu0 %v1439_v55 }
 0x7dc   : > { %v2941_v54 = vpop.xlane.xlu1 %1450 }
 0x7dd   : > { %vm1464_vm1 = vcmp.eq.f32.partialorder %v1423_v17, %v2941_v54  ;;  %vm1465_vm3 = vcmp.eq.f32.partialorder %v1424_v21, %v2941_v54  ;;  %vm1466_vm5 = vcmp.eq.f32.partialorder %v1425_v26, %v2941_v54  ;;  %vm1467_vm8 = vcmp.eq.f32.partialorder %v1426_v42, %v2941_v54 }
 0x7de   : > { %vm1468_vm10 = vcmp.eq.f32.partialorder %v1427_v30, %v2941_v54  ;;  %vm1469_vm9 = vcmp.eq.f32.partialorder %v1428_v0, %v2941_v54  ;;  %v1482_v14 = vsel %vm1464_vm1, 3e+38, %v1423_v17  ;;  %v1483_v10 = vsel %vm1465_vm3, 3e+38, %v1424_v21 }
 0x7df   : > { %v1484_v41 = vsel %vm1466_vm5, 3e+38, %v1425_v26  ;;  %vm1470_vm7 = vcmp.eq.f32.partialorder %v1429_v23, %v2941_v54  ;;  %v1485_v34 = vsel %vm1467_vm8, 3e+38, %v1426_v42  ;;  %v1486_v59 = vsel %vm1468_vm10, 3e+38, %v1427_v30 }
 0x7e0   : > { %v1501_v50 = vmin.f32 %v1482_v14, %v1484_v41  ;;  %v1502_v2 = vmin.f32 %v1483_v10, %v1485_v34  ;;  %vm1471_vm11 = vcmp.eq.f32.partialorder %v1430_v24, %v2941_v54  ;;  %vm1472_vm12 = vcmp.eq.f32.partialorder %v1431_v6, %v2941_v54 }
 0x7e1   : > { %v1487_v19 = vsel %vm1469_vm9, 3e+38, %v1428_v0  ;;  %v1488_v28 = vsel %vm1470_vm7, 3e+38, %v1429_v23  ;;  %v1489_v43 = vsel %vm1471_vm11, 3e+38, %v1430_v24 }
 0x7e2   : > { %v1503_v63 = vmin.f32 %v1501_v50, %v1486_v59  ;;  %v1504_v25 = vmin.f32 %v1502_v2, %v1487_v19  ;;  %v1490_v1 = vsel %vm1472_vm12, 3e+38, %v1431_v6 }
 0x7e4   : > { %v1505_v7 = vmin.f32 %v1503_v63, %v1488_v28  ;;  %v1506_v17 = vmin.f32 %v1504_v25, %v1489_v43 }
 0x7e6   : > { %v1507_v21 = vmin.f32 %v1505_v7, %v1490_v1 }
 0x7e8   : > { %v1508_v26 = vmin.f32 %v1507_v21, %v1506_v17 }
 0x7ea   : > { %1509 = vmin.xlane.f32.xlu1 %v1508_v26 }
 0x804   : > { %v2952_v31 = vpop.xlane.xlu0 %1440 }
 0x805   : > { %vm1455_vm14 = vcmp.eq.f32.partialorder %v1414_v35, %v2952_v31  ;;  %vm1456_vm13 = vcmp.eq.f32.partialorder %v1415_v48, %v2952_v31  ;;  %vm1457_vm15 = vcmp.eq.f32.partialorder %v1416_v32, %v2952_v31  ;;  %vm1458_vm0 = vcmp.eq.f32.partialorder %v1417_v20, %v2952_v31 }
 0x806   : > { %vm1459_vm2 = vcmp.eq.f32.partialorder %v1418_v57, %v2952_v31  ;;  %vm1460_vm4 = vcmp.eq.f32.partialorder %v1419_v45, %v2952_v31  ;;  %v1473_v42 = vsel %vm1455_vm14, 3e+38, %v1414_v35  ;;  %v1474_v30 = vsel %vm1456_vm13, 3e+38, %v1415_v48 }
 0x807   : > { %v1475_v0 = vsel %vm1457_vm15, 3e+38, %v1416_v32  ;;  %vm1461_vm6 = vcmp.eq.f32.partialorder %v1420_v40, %v2952_v31  ;;  %v1476_v23 = vsel %vm1458_vm0, 3e+38, %v1417_v20  ;;  %v1477_v6 = vsel %vm1459_vm2, 3e+38, %v1418_v57 }
 0x808   : > { %v1491_v24 = vmin.f32 %v1473_v42, %v1475_v0  ;;  %v1492_v16 = vmin.f32 %v1474_v30, %v1476_v23  ;;  %vm1462_vm1 = vcmp.eq.f32.partialorder %v1421_v47, %v2952_v31  ;;  %vm1463_vm3 = vcmp.eq.f32.partialorder %v1422_v9, %v2952_v31 }
 0x809   : > { %v1478_v36 = vsel %vm1460_vm4, 3e+38, %v1419_v45  ;;  %v1479_v56 = vsel %vm1461_vm6, 3e+38, %v1420_v40  ;;  %v1480_v13 = vsel %vm1462_vm1, 3e+38, %v1421_v47 }
 0x80a   : > { %v1493_v29 = vmin.f32 %v1491_v24, %v1477_v6  ;;  %v1494_v27 = vmin.f32 %v1492_v16, %v1478_v36  ;;  %v1481_v55 = vsel %vm1463_vm3, 3e+38, %v1422_v9 }
 0x80c   : > { %v1495_v38 = vmin.f32 %v1493_v29, %v1479_v56  ;;  %v1496_v35 = vmin.f32 %v1494_v27, %v1480_v13 }
 0x80e   : > { %v1497_v48 = vmin.f32 %v1495_v38, %v1481_v55 }
 0x810   : > { %v1498_v32 = vmin.f32 %v1497_v48, %v1496_v35 }
 0x812   : > { %1499 = vmin.xlane.f32.xlu0 %v1498_v32 }
 0x873   : > { %v2963_v50 = vpop.xlane.xlu1 %1509 }
 0x874   : > { %vm1523_vm5 = vcmp.eq.f32.partialorder %v1482_v14, %v2963_v50  ;;  %vm1524_vm8 = vcmp.eq.f32.partialorder %v1483_v10, %v2963_v50  ;;  %vm1525_vm10 = vcmp.eq.f32.partialorder %v1484_v41, %v2963_v50  ;;  %vm1526_vm9 = vcmp.eq.f32.partialorder %v1485_v34, %v2963_v50 }
 0x875   : > { %vm1527_vm7 = vcmp.eq.f32.partialorder %v1486_v59, %v2963_v50  ;;  %vm1528_vm11 = vcmp.eq.f32.partialorder %v1487_v19, %v2963_v50  ;;  %v1541_v20 = vsel %vm1523_vm5, 3e+38, %v1482_v14  ;;  %v1542_v57 = vsel %vm1524_vm8, 3e+38, %v1483_v10 }
 0x876   : > { %v1543_v45 = vsel %vm1525_vm10, 3e+38, %v1484_v41  ;;  %vm1529_vm12 = vcmp.eq.f32.partialorder %v1488_v28, %v2963_v50  ;;  %v1544_v40 = vsel %vm1526_vm9, 3e+38, %v1485_v34  ;;  %v1545_v9 = vsel %vm1527_vm7, 3e+38, %v1486_v59 }
 0x877   : > { %v1560_v47 = vmin.f32 %v1541_v20, %v1543_v45  ;;  %v1561_v2 = vmin.f32 %v1542_v57, %v1544_v40  ;;  %vm1530_vm14 = vcmp.eq.f32.partialorder %v1489_v43, %v2963_v50  ;;  %vm1531_vm13 = vcmp.eq.f32.partialorder %v1490_v1, %v2963_v50 }
 0x878   : > { %v1546_v63 = vsel %vm1528_vm11, 3e+38, %v1487_v19  ;;  %v1547_v7 = vsel %vm1529_vm12, 3e+38, %v1488_v28  ;;  %v1548_v26 = vsel %vm1530_vm14, 3e+38, %v1489_v43 }
 0x879   : > { %v1562_v25 = vmin.f32 %v1560_v47, %v1545_v9  ;;  %v1563_v17 = vmin.f32 %v1561_v2, %v1546_v63  ;;  %v1549_v24 = vsel %vm1531_vm13, 3e+38, %v1490_v1 }
 0x87b   : > { %v1564_v21 = vmin.f32 %v1562_v25, %v1547_v7  ;;  %v1565_v14 = vmin.f32 %v1563_v17, %v1548_v26 }
 0x87d   : > { %v1566_v10 = vmin.f32 %v1564_v21, %v1549_v24 }
 0x87f   : > { %v1567_v41 = vmin.f32 %v1566_v10, %v1565_v14 }
 0x881   : > { %1568 = vmin.xlane.f32.xlu1 %v1567_v41 }
 0x89b   : > { %v2974_v16 = vpop.xlane.xlu0 %1499 }
 0x89c   : > { %vm1514_vm15 = vcmp.eq.f32.partialorder %v1473_v42, %v2974_v16  ;;  %vm1515_vm0 = vcmp.eq.f32.partialorder %v1474_v30, %v2974_v16  ;;  %vm1516_vm2 = vcmp.eq.f32.partialorder %v1475_v0, %v2974_v16  ;;  %vm1517_vm4 = vcmp.eq.f32.partialorder %v1476_v23, %v2974_v16 }
 0x89d   : > { %vm1518_vm6 = vcmp.eq.f32.partialorder %v1477_v6, %v2974_v16  ;;  %vm1519_vm1 = vcmp.eq.f32.partialorder %v1478_v36, %v2974_v16  ;;  %v1532_v34 = vsel %vm1514_vm15, 3e+38, %v1473_v42  ;;  %v1533_v59 = vsel %vm1515_vm0, 3e+38, %v1474_v30 }
 0x89e   : > { %v1534_v19 = vsel %vm1516_vm2, 3e+38, %v1475_v0  ;;  %vm1520_vm3 = vcmp.eq.f32.partialorder %v1479_v56, %v2974_v16  ;;  %v1535_v28 = vsel %vm1517_vm4, 3e+38, %v1476_v23  ;;  %v1536_v1 = vsel %vm1518_vm6, 3e+38, %v1477_v6 }
 0x89f   : > { %v1550_v43 = vmin.f32 %v1532_v34, %v1534_v19  ;;  %v1551_v29 = vmin.f32 %v1533_v59, %v1535_v28  ;;  %vm1521_vm5 = vcmp.eq.f32.partialorder %v1480_v13, %v2974_v16  ;;  %vm1522_vm8 = vcmp.eq.f32.partialorder %v1481_v55, %v2974_v16 }
 0x8a0   : > { %v1537_v27 = vsel %vm1519_vm1, 3e+38, %v1478_v36  ;;  %v1538_v35 = vsel %vm1520_vm3, 3e+38, %v1479_v56  ;;  %v1539_v47 = vsel %vm1521_vm5, 3e+38, %v1480_v13 }
 0x8a1   : > { %v1552_v38 = vmin.f32 %v1550_v43, %v1536_v1  ;;  %v1553_v48 = vmin.f32 %v1551_v29, %v1537_v27  ;;  %v1540_v2 = vsel %vm1522_vm8, 3e+38, %v1481_v55 }
 0x8a3   : > { %v1554_v32 = vmin.f32 %v1552_v38, %v1538_v35  ;;  %v1555_v42 = vmin.f32 %v1553_v48, %v1539_v47 }
 0x8a5   : > { %v1556_v30 = vmin.f32 %v1554_v32, %v1540_v2 }
 0x8a7   : > { %v1557_v0 = vmin.f32 %v1556_v30, %v1555_v42 }
 0x8a9   : > { %1558 = vmin.xlane.f32.xlu0 %v1557_v0 }
 0x90a   : > { %v2985_v25 = vpop.xlane.xlu1 %1568 }
 0x90b   : > { %vm1582_vm10 = vcmp.eq.f32.partialorder %v1541_v20, %v2985_v25  ;;  %vm1583_vm9 = vcmp.eq.f32.partialorder %v1542_v57, %v2985_v25  ;;  %vm1584_vm7 = vcmp.eq.f32.partialorder %v1543_v45, %v2985_v25  ;;  %vm1585_vm11 = vcmp.eq.f32.partialorder %v1544_v40, %v2985_v25 }
 0x90c   : > { %vm1586_vm12 = vcmp.eq.f32.partialorder %v1545_v9, %v2985_v25  ;;  %vm1587_vm14 = vcmp.eq.f32.partialorder %v1546_v63, %v2985_v25  ;;  %v1600_v23 = vsel %vm1582_vm10, 3e+38, %v1541_v20  ;;  %v1601_v6 = vsel %vm1583_vm9, 3e+38, %v1542_v57 }
 0x90d   : > { %v1602_v36 = vsel %vm1584_vm7, 3e+38, %v1543_v45  ;;  %vm1588_vm13 = vcmp.eq.f32.partialorder %v1547_v7, %v2985_v25  ;;  %v1603_v56 = vsel %vm1585_vm11, 3e+38, %v1544_v40  ;;  %v1604_v55 = vsel %vm1586_vm12, 3e+38, %v1545_v9 }
 0x90e   : > { %v1619_v13 = vmin.f32 %v1600_v23, %v1602_v36  ;;  %v1620_v17 = vmin.f32 %v1601_v6, %v1603_v56  ;;  %vm1589_vm15 = vcmp.eq.f32.partialorder %v1548_v26, %v2985_v25  ;;  %vm1590_vm0 = vcmp.eq.f32.partialorder %v1549_v24, %v2985_v25 }
 0x90f   : > { %v1605_v21 = vsel %vm1587_vm14, 3e+38, %v1546_v63  ;;  %v1606_v10 = vsel %vm1588_vm13, 3e+38, %v1547_v7  ;;  %v1607_v29 = vsel %vm1589_vm15, 3e+38, %v1548_v26 }
 0x910   : > { %v1621_v14 = vmin.f32 %v1619_v13, %v1604_v55  ;;  %v1622_v41 = vmin.f32 %v1620_v17, %v1605_v21  ;;  %v1608_v38 = vsel %vm1590_vm0, 3e+38, %v1549_v24 }
 0x912   : > { %v1623_v43 = vmin.f32 %v1621_v14, %v1606_v10  ;;  %v1624_v20 = vmin.f32 %v1622_v41, %v1607_v29 }
 0x914   : > { %v1625_v57 = vmin.f32 %v1623_v43, %v1608_v38 }
 0x916   : > { %v1626_v45 = vmin.f32 %v1625_v57, %v1624_v20 }
 0x918   : > { %1627 = vmin.xlane.f32.xlu1 %v1626_v45 }
 0x932   : > { %v2996_v48 = vpop.xlane.xlu0 %1558 }
 0x933   : > { %vm1573_vm2 = vcmp.eq.f32.partialorder %v1532_v34, %v2996_v48  ;;  %vm1574_vm4 = vcmp.eq.f32.partialorder %v1533_v59, %v2996_v48  ;;  %vm1575_vm6 = vcmp.eq.f32.partialorder %v1534_v19, %v2996_v48  ;;  %vm1576_vm1 = vcmp.eq.f32.partialorder %v1535_v28, %v2996_v48 }
 0x934   : > { %vm1577_vm3 = vcmp.eq.f32.partialorder %v1536_v1, %v2996_v48  ;;  %vm1578_vm5 = vcmp.eq.f32.partialorder %v1537_v27, %v2996_v48  ;;  %v1591_v40 = vsel %vm1573_vm2, 3e+38, %v1532_v34  ;;  %v1592_v9 = vsel %vm1574_vm4, 3e+38, %v1533_v59 }
 0x935   : > { %v1593_v63 = vsel %vm1575_vm6, 3e+38, %v1534_v19  ;;  %vm1579_vm8 = vcmp.eq.f32.partialorder %v1538_v35, %v2996_v48  ;;  %v1594_v7 = vsel %vm1576_vm1, 3e+38, %v1535_v28  ;;  %v1595_v24 = vsel %vm1577_vm3, 3e+38, %v1536_v1 }
 0x936   : > { %v1609_v26 = vmin.f32 %v1591_v40, %v1593_v63  ;;  %v1610_v32 = vmin.f32 %v1592_v9, %v1594_v7  ;;  %vm1580_vm10 = vcmp.eq.f32.partialorder %v1539_v47, %v2996_v48  ;;  %vm1581_vm9 = vcmp.eq.f32.partialorder %v1540_v2, %v2996_v48 }
 0x937   : > { %v1596_v42 = vsel %vm1578_vm5, 3e+38, %v1537_v27  ;;  %v1597_v0 = vsel %vm1579_vm8, 3e+38, %v1538_v35  ;;  %v1598_v14 = vsel %vm1580_vm10, 3e+38, %v1539_v47 }
 0x938   : > { %v1611_v30 = vmin.f32 %v1609_v26, %v1595_v24  ;;  %v1612_v13 = vmin.f32 %v1610_v32, %v1596_v42  ;;  %v1599_v41 = vsel %vm1581_vm9, 3e+38, %v1540_v2 }
 0x93a   : > { %v1613_v17 = vmin.f32 %v1611_v30, %v1597_v0  ;;  %v1614_v34 = vmin.f32 %v1612_v13, %v1598_v14 }
 0x93c   : > { %v1615_v59 = vmin.f32 %v1613_v17, %v1599_v41 }
 0x93e   : > { %v1616_v19 = vmin.f32 %v1615_v59, %v1614_v34 }
 0x940   : > { %1617 = vmin.xlane.f32.xlu0 %v1616_v19 }
 0x9a1   : > { %v3007_v43 = vpop.xlane.xlu1 %1627 }
 0x9a2   : > { %vm1641_vm7 = vcmp.eq.f32.partialorder %v1600_v23, %v3007_v43  ;;  %vm1642_vm11 = vcmp.eq.f32.partialorder %v1601_v6, %v3007_v43  ;;  %vm1643_vm12 = vcmp.eq.f32.partialorder %v1602_v36, %v3007_v43  ;;  %vm1644_vm14 = vcmp.eq.f32.partialorder %v1603_v56, %v3007_v43 }
 0x9a3   : > { %vm1645_vm13 = vcmp.eq.f32.partialorder %v1604_v55, %v3007_v43  ;;  %vm1646_vm15 = vcmp.eq.f32.partialorder %v1605_v21, %v3007_v43  ;;  %v1659_v28 = vsel %vm1641_vm7, 3e+38, %v1600_v23  ;;  %v1660_v1 = vsel %vm1642_vm11, 3e+38, %v1601_v6 }
 0x9a4   : > { %v1661_v27 = vsel %vm1643_vm12, 3e+38, %v1602_v36  ;;  %vm1647_vm0 = vcmp.eq.f32.partialorder %v1606_v10, %v3007_v43  ;;  %v1662_v35 = vsel %vm1644_vm14, 3e+38, %v1603_v56  ;;  %v1663_v2 = vsel %vm1645_vm13, 3e+38, %v1604_v55 }
 0x9a5   : > { %v1678_v47 = vmin.f32 %v1659_v28, %v1661_v27  ;;  %v1679_v20 = vmin.f32 %v1660_v1, %v1662_v35  ;;  %vm1648_vm2 = vcmp.eq.f32.partialorder %v1607_v29, %v3007_v43  ;;  %vm1649_vm4 = vcmp.eq.f32.partialorder %v1608_v38, %v3007_v43 }
 0x9a6   : > { %v1664_v57 = vsel %vm1646_vm15, 3e+38, %v1605_v21  ;;  %v1665_v26 = vsel %vm1647_vm0, 3e+38, %v1606_v10  ;;  %v1666_v13 = vsel %vm1648_vm2, 3e+38, %v1607_v29 }
 0x9a7   : > { %v1680_v45 = vmin.f32 %v1678_v47, %v1663_v2  ;;  %v1681_v32 = vmin.f32 %v1679_v20, %v1664_v57  ;;  %v1667_v17 = vsel %vm1649_vm4, 3e+38, %v1608_v38 }
 0x9a9   : > { %v1682_v30 = vmin.f32 %v1680_v45, %v1665_v26  ;;  %v1683_v23 = vmin.f32 %v1681_v32, %v1666_v13 }
 0x9ab   : > { %v1684_v6 = vmin.f32 %v1682_v30, %v1667_v17 }
 0x9ad   : > { %v1685_v36 = vmin.f32 %v1684_v6, %v1683_v23 }
 0x9af   : > { %1686 = vmin.xlane.f32.xlu1 %v1685_v36 }
 0x9c9   : > { %v3018_v34 = vpop.xlane.xlu0 %1617 }
 0x9ca   : > { %vm1632_vm6 = vcmp.eq.f32.partialorder %v1591_v40, %v3018_v34  ;;  %vm1633_vm1 = vcmp.eq.f32.partialorder %v1592_v9, %v3018_v34  ;;  %vm1634_vm3 = vcmp.eq.f32.partialorder %v1593_v63, %v3018_v34  ;;  %vm1635_vm5 = vcmp.eq.f32.partialorder %v1594_v7, %v3018_v34 }
 0x9cb   : > { %vm1636_vm8 = vcmp.eq.f32.partialorder %v1595_v24, %v3018_v34  ;;  %vm1637_vm10 = vcmp.eq.f32.partialorder %v1596_v42, %v3018_v34  ;;  %v1650_v56 = vsel %vm1632_vm6, 3e+38, %v1591_v40  ;;  %v1651_v55 = vsel %vm1633_vm1, 3e+38, %v1592_v9 }
 0x9cc   : > { %v1652_v21 = vsel %vm1634_vm3, 3e+38, %v1593_v63  ;;  %vm1638_vm9 = vcmp.eq.f32.partialorder %v1597_v0, %v3018_v34  ;;  %v1653_v10 = vsel %vm1635_vm5, 3e+38, %v1594_v7  ;;  %v1654_v38 = vsel %vm1636_vm8, 3e+38, %v1595_v24 }
 0x9cd   : > { %v1668_v29 = vmin.f32 %v1650_v56, %v1652_v21  ;;  %v1669_v59 = vmin.f32 %v1651_v55, %v1653_v10  ;;  %vm1639_vm7 = vcmp.eq.f32.partialorder %v1598_v14, %v3018_v34  ;;  %vm1640_vm11 = vcmp.eq.f32.partialorder %v1599_v41, %v3018_v34 }
 0x9ce   : > { %v1655_v19 = vsel %vm1637_vm10, 3e+38, %v1596_v42  ;;  %v1656_v20 = vsel %vm1638_vm9, 3e+38, %v1597_v0  ;;  %v1657_v30 = vsel %vm1639_vm7, 3e+38, %v1598_v14 }
 0x9cf   : > { %v1670_v47 = vmin.f32 %v1668_v29, %v1654_v38  ;;  %v1671_v45 = vmin.f32 %v1669_v59, %v1655_v19  ;;  %v1658_v23 = vsel %vm1640_vm11, 3e+38, %v1599_v41 }
 0x9d1   : > { %v1672_v32 = vmin.f32 %v1670_v47, %v1656_v20  ;;  %v1673_v40 = vmin.f32 %v1671_v45, %v1657_v30 }
 0x9d3   : > { %v1674_v9 = vmin.f32 %v1672_v32, %v1658_v23 }
 0x9d5   : > { %v1675_v63 = vmin.f32 %v1674_v9, %v1673_v40 }
 0x9d7   : > { %1676 = vmin.xlane.f32.xlu0 %v1675_v63 }
 0xa38   : > { %v3029_v6 = vpop.xlane.xlu1 %1686 }
 0xa39   : > { %vm1700_vm12 = vcmp.eq.f32.partialorder %v1659_v28, %v3029_v6  ;;  %vm1701_vm14 = vcmp.eq.f32.partialorder %v1660_v1, %v3029_v6  ;;  %vm1702_vm13 = vcmp.eq.f32.partialorder %v1661_v27, %v3029_v6  ;;  %vm1703_vm15 = vcmp.eq.f32.partialorder %v1662_v35, %v3029_v6 }
 0xa3a   : > { %vm1704_vm0 = vcmp.eq.f32.partialorder %v1663_v2, %v3029_v6  ;;  %vm1705_vm2 = vcmp.eq.f32.partialorder %v1664_v57, %v3029_v6  ;;  %v1718_v7 = vsel %vm1700_vm12, 3e+38, %v1659_v28  ;;  %v1719_v24 = vsel %vm1701_vm14, 3e+38, %v1660_v1 }
 0xa3b   : > { %v1720_v42 = vsel %vm1702_vm13, 3e+38, %v1661_v27  ;;  %vm1706_vm4 = vcmp.eq.f32.partialorder %v1665_v26, %v3029_v6  ;;  %v1721_v0 = vsel %vm1703_vm15, 3e+38, %v1662_v35  ;;  %v1722_v41 = vsel %vm1704_vm0, 3e+38, %v1663_v2 }
 0xa3c   : > { %v1737_v14 = vmin.f32 %v1718_v7, %v1720_v42  ;;  %v1738_v36 = vmin.f32 %v1719_v24, %v1721_v0  ;;  %vm1707_vm6 = vcmp.eq.f32.partialorder %v1666_v13, %v3029_v6  ;;  %vm1708_vm1 = vcmp.eq.f32.partialorder %v1667_v17, %v3029_v6 }
 0xa3d   : > { %v1723_v29 = vsel %vm1705_vm2, 3e+38, %v1664_v57  ;;  %v1724_v47 = vsel %vm1706_vm4, 3e+38, %v1665_v26  ;;  %v1725_v40 = vsel %vm1707_vm6, 3e+38, %v1666_v13 }
 0xa3e   : > { %v1739_v59 = vmin.f32 %v1737_v14, %v1722_v41  ;;  %v1740_v45 = vmin.f32 %v1738_v36, %v1723_v29  ;;  %v1726_v9 = vsel %vm1708_vm1, 3e+38, %v1667_v17 }
 0xa40   : > { %v1741_v32 = vmin.f32 %v1739_v59, %v1724_v47  ;;  %v1742_v28 = vmin.f32 %v1740_v45, %v1725_v40  ;;  %v3337_v59 = vld [vmem:[#allocation6_spill] sm:$0xff] }
 0xa41   : > { %vm803_vm13 = vcmp.eq.s32.totalorder %v3337_v59, 0  ;;  %vm862_vm15 = vcmp.eq.s32.totalorder %v3337_v59, 1  ;;  %vm921_vm0 = vcmp.eq.s32.totalorder %v3337_v59, 2  ;;  %vm980_vm2 = vcmp.eq.s32.totalorder %v3337_v59, 3 }
 0xa42   : > { %v1743_v1 = vmin.f32 %v1741_v32, %v1726_v9  ;;  %vm1039_vm4 = vcmp.eq.s32.totalorder %v3337_v59, 4  ;;  %vm1098_vm6 = vcmp.eq.s32.totalorder %v3337_v59, 5  ;;  %vm1157_vm1 = vcmp.eq.s32.totalorder %v3337_v59, 6 }
 0xa44   : > { %v1744_v27 = vmin.f32 %v1743_v1, %v1742_v28 }
 0xa46   : > { %1745 = vmin.xlane.f32.xlu1 %v1744_v27 }
 0xa60   : > { %v3040_v63 = vpop.xlane.xlu0 %1676 }
 0xa61   : > { %vm1691_vm3 = vcmp.eq.f32.partialorder %v1650_v56, %v3040_v63  ;;  %vm1692_vm5 = vcmp.eq.f32.partialorder %v1651_v55, %v3040_v63  ;;  %vm1693_vm8 = vcmp.eq.f32.partialorder %v1652_v21, %v3040_v63  ;;  %vm1694_vm10 = vcmp.eq.f32.partialorder %v1653_v10, %v3040_v63 }
 0xa62   : > { %vm1695_vm9 = vcmp.eq.f32.partialorder %v1654_v38, %v3040_v63  ;;  %vm1696_vm7 = vcmp.eq.f32.partialorder %v1655_v19, %v3040_v63  ;;  %v1709_v35 = vsel %vm1691_vm3, 3e+38, %v1650_v56  ;;  %v1710_v2 = vsel %vm1692_vm5, 3e+38, %v1651_v55 }
 0xa63   : > { %v1711_v57 = vsel %vm1693_vm8, 3e+38, %v1652_v21  ;;  %vm1697_vm11 = vcmp.eq.f32.partialorder %v1656_v20, %v3040_v63  ;;  %v1712_v26 = vsel %vm1694_vm10, 3e+38, %v1653_v10  ;;  %v1713_v17 = vsel %vm1695_vm9, 3e+38, %v1654_v38 }
 0xa64   : > { %v1727_v13 = vmin.f32 %v1709_v35, %v1711_v57  ;;  %v1728_v7 = vmin.f32 %v1710_v2, %v1712_v26  ;;  %vm1698_vm12 = vcmp.eq.f32.partialorder %v1657_v30, %v3040_v63  ;;  %vm1699_vm14 = vcmp.eq.f32.partialorder %v1658_v23, %v3040_v63 }
 0xa65   : > { %v1714_v24 = vsel %vm1696_vm7, 3e+38, %v1655_v19  ;;  %v1715_v0 = vsel %vm1697_vm11, 3e+38, %v1656_v20  ;;  %v1716_v36 = vsel %vm1698_vm12, 3e+38, %v1657_v30 }
 0xa66   : > { %v1729_v42 = vmin.f32 %v1727_v13, %v1713_v17  ;;  %v1730_v14 = vmin.f32 %v1728_v7, %v1714_v24  ;;  %v1717_v29 = vsel %vm1699_vm14, 3e+38, %v1658_v23  ;;  %v805_v10 = vsel %vm803_vm13, %v2681_v33, 3e+38 }
 0xa67   : > { %v864_v38 = vsel %vm862_vm15, %v2721_v11, %v805_v10  ;;  %vm1216_vm3 = vcmp.eq.s32.totalorder %v3337_v59, 7  ;;  %vm1275_vm5 = vcmp.eq.s32.totalorder %v3337_v59, 8  ;;  %vm3264_vm8 = vcmp.eq.s32.totalorder %v3337_v59, 9 }
 0xa68   : > { %v1731_v41 = vmin.f32 %v1729_v42, %v1715_v0  ;;  %v1732_v56 = vmin.f32 %v1730_v14, %v1716_v36  ;;  %v923_v19 = vsel %vm921_vm0, %v2743_v37, %v864_v38  ;;  %vm1393_vm10 = vcmp.eq.s32.totalorder %v3337_v59, 10 }
 0xa69   : > { %v982_v20 = vsel %vm980_vm2, %v2765_v62, %v923_v19  ;;  %vm1452_vm9 = vcmp.eq.s32.totalorder %v3337_v59, 11  ;;  %vm1511_vm7 = vcmp.eq.s32.totalorder %v3337_v59, 12  ;;  %vm1570_vm11 = vcmp.eq.s32.totalorder %v3337_v59, 13 }
 0xa6a   : > { %v1733_v55 = vmin.f32 %v1731_v41, %v1717_v29  ;;  %v1041_v33 = vsel %vm1039_vm4, %v2787_v49, %v982_v20  ;;  %vm1629_vm12 = vcmp.eq.s32.totalorder %v3337_v59, 14  ;;  %vm1688_vm14 = vcmp.eq.s32.totalorder %v3337_v59, 15 }
 0xa6b   : > { %v1100_v11 = vsel %vm1098_vm6, %v2809_v4, %v1041_v33 }
 0xa6c   : > { %v1734_v21 = vmin.f32 %v1733_v55, %v1732_v56  ;;  %v1159_v37 = vsel %vm1157_vm1, %v2831_v51, %v1100_v11 }
 0xa6d   : > { %v1218_v62 = vsel %vm1216_vm3, %v2853_v3, %v1159_v37 }
 0xa6e   : > { %1735 = vmin.xlane.f32.xlu0 %v1734_v21  ;;  %v1277_v49 = vsel %vm1275_vm5, %v2875_v46, %v1218_v62 }
 0xa6f   : > { %v1336_v4 = vsel %vm3264_vm8, %v2897_v22, %v1277_v49  ;;  %vm1747_vm8 = vcmp.eq.s32.totalorder %v3337_v59, 16 }
 0xa70   : > { %v1395_v51 = vsel %vm1393_vm10, %v2919_v60, %v1336_v4 }
 0xa71   : > { %v1454_v3 = vsel %vm1452_vm9, %v2941_v54, %v1395_v51 }
 0xa72   : > { %v1513_v46 = vsel %vm1511_vm7, %v2963_v50, %v1454_v3  ;;  %v804_v50 = vsel %vm803_vm13, %v2710_v15, 3e+38  ;;  %vm3338_vm13 = vcmp.eq.s32.totalorder %v3337_v59, 9 }
 0xa73   : > { %v1572_v22 = vsel %vm1570_vm11, %v2985_v25, %v1513_v46  ;;  %v863_v25 = vsel %vm862_vm15, %v2732_v18, %v804_v50 }
 0xa74   : > { %v1631_v60 = vsel %vm1629_vm12, %v3007_v43, %v1572_v22  ;;  %v922_v43 = vsel %vm921_vm0, %v2754_v12, %v863_v25 }
 0xa75   : > { %v1690_v54 = vsel %vm1688_vm14, %v3029_v6, %v1631_v60  ;;  %v981_v6 = vsel %vm980_vm2, %v2776_v8, %v922_v43 }
 0xa76   : > { %v1040_v47 = vsel %vm1039_vm4, %v2798_v58, %v981_v6 }
 0xa77   : > { %v1099_v15 = vsel %vm1098_vm6, %v2820_v39, %v1040_v47 }
 0xa78   : > { %v1158_v18 = vsel %vm1157_vm1, %v2842_v5, %v1099_v15 }
 0xa79   : > { %v1217_v12 = vsel %vm1216_vm3, %v2864_v61, %v1158_v18 }
 0xa7a   : > { %v1276_v8 = vsel %vm1275_vm5, %v2886_v53, %v1217_v12 }
 0xa7b   : > { %v1335_v58 = vsel %vm3338_vm13, %v2908_v52, %v1276_v8 }
 0xa7c   : > { %v1394_v39 = vsel %vm1393_vm10, %v2930_v44, %v1335_v58 }
 0xa7d   : > { %v1453_v5 = vsel %vm1452_vm9, %v2952_v31, %v1394_v39 }
 0xa7e   : > { %v1512_v61 = vsel %vm1511_vm7, %v2974_v16, %v1453_v5 }
 0xa7f   : > { %v1571_v53 = vsel %vm1570_vm11, %v2996_v48, %v1512_v61 }
 0xa80   : > { %v1630_v52 = vsel %vm1629_vm12, %v3018_v34, %v1571_v53 }
 0xa81   : > { %v1689_v44 = vsel %vm1688_vm14, %v3040_v63, %v1630_v52 }
 0xacf   : > { %v1746_v30 = vpop.xlane.xlu1 %1745 }
 0xad0   : > { %v1749_v23 = vsel %vm1747_vm8, %v1746_v30, %v1690_v54 }
 0xad1   : > { %1751 = vst [vmem:[#allocation2 + $0x8] sm:$0xff] %v1749_v23 }
 0xaf5   : > { %1755 = sbr.rel (%p1878_p1) target bundleno = 2813 (0xafd), region = 36 }
 0xaf7   : > { %v1736_v45 = vpop.xlane.xlu0 %1735 }
 0xaf8   : > { %v1748_v31 = vsel %vm1747_vm8, %v1736_v45, %v1689_v44 }
 0xaf9   : > { %1750 = vst [vmem:[#allocation2] sm:$0xff] %v1748_v31 }
 0xafa   : > { %v1758_v16 = vand.u32 2047, %v1748_v31  ;;  %v1759_v48 = vand.u32 2047, %v1749_v23 }
 0xafc   : > { %1760 = vst [vmem:[%s2164_s18] sm:$0xff] %v1758_v16  ;;  %1761 = vst [vmem:[%s2164_s18 + $0x8] sm:$0xff] %v1759_v48 }
 0xafd PF: > { %s1884_s27 = sshll.u32 %s2046_s13, 8  ;;  %s1776_s3 = sshll.u32 %s2164_s18, 4  ;;  %s3178_s3 = int_to_ptr.vmem [resolvable:$true] %s1776_s3 }
 0xafe   : > { %s3175_s30 = scalar_lea.hbm %s3235_s2, %s1884_s27  ;;  %s3182_s12 = scalar_lea.sflag [#allocation4], %s163_s26 }
 0xaff   : > { %s1966_s4 = scalar_lea.vmem %s3178_s3, 256  ;;  %s2064_s13 = smov [#allocation3]  }
 0xb00   : > { %p1967_p2 = scmp.ne.s32.totalorder %s3178_s3, %s1966_s4  ;;  %s1970_s5 = sshll.u32 %s2064_s13, 4  ;;  %s1971_s5 = int_to_ptr.vmem [resolvable:$false] %s1970_s5 }
 0xb01   : > { %s1972_s6 = scalar_lea.vmem %s1971_s5, 512  ;;  %p1973_p6 = scmp.lt.s32.totalorder %s3178_s3, %s1971_s5 }
 0xb02   : > { %p1968_p4 = pnand %p1967_p2, %p2131_p3  ;;  %p1974_p7 = scmp.lt.s32.totalorder %s1972_s6, %s1966_s4 }
 0xb04   : > { %p1969_p5 = pneg %p1968_p4  ;;  %p1975_p8 = por %p1974_p7, %p1973_p6 }
 0xb06   : > { %p1976_p10 = pnand %p1975_p8, %p1969_p5 }
 0xb08   : > { %1979 = shalt.err (!%p1976_p10)
}
 0xb09   : > { %s1980_s26 = scalar_lea.hbm %s3175_s30, 256  ;;  %s1984_s17 = scalar_lea.hbm %s3235_s2, 24064 }
 0xb0a   : > { %p1981_p11 = scmp.ne.s32.totalorder %s3175_s30, %s1980_s26  ;;  %p1985_p0 = scmp.lt.s32.totalorder %s3175_s30, %s3235_s2 }
 0xb0b   : > { %p1986_p1 = scmp.lt.s32.totalorder %s1984_s17, %s1980_s26 }
 0xb0c   : > { %p1982_p12 = pnand %p1981_p11, %p2131_p3 }
 0xb0d   : > { %p1987_p2 = por %p1986_p1, %p1985_p0 }
 0xb0e   : > { %p1983_p13 = pneg %p1982_p12 }
 0xb10   : > { %p1988_p4 = pnand %p1987_p2, %p1983_p13 }
 0xb12   : > { %1991 = shalt.err (!%p1988_p4)
}
 0xb13   : > { %s2065_s24 = smov 128   ;;  %s2066_s27 = smov 8  }
 0xb14   : > { %1885 = dma.vmem_to_hbm [thread:$0]  (%p2131_p3), %s3178_s3, 256, %s3175_s30, %s3182_s12, %s2065_s24, %s2065_s24, %s2066_s27  }
 0xb15 PF: > { %p1891_p5 = scmp.ge.s32.totalorder %s2058_s16, 2  ;;  %s1791_s28 = sand.u32 1, %s2030_s9  }
 0xb16   : > { %s1792_s29 = scalar_lea.sflag [#allocation4], %s1791_s28 }
 0xb17   : > { %p1888_p6 = pnand %p1891_p5, %p2141_p9 }
 0xb19   : > { %p1889_p7 = pneg %p1888_p6 }
 0xb1b   : > { %2025 = dma.done.wait (%p1889_p7), %s1792_s29, 256  }
 0xb1c   : > { %2027 = vsyncadd (%p1889_p7), %s1792_s29, 4294967040  ;;  %s15_s16 = sadd.s32 1, %s2058_s16   ;;  %s3339_s9 = smov %s2034_s10 }
 0xb1d   : > { %p12_p8 = scmp.ge.s32.totalorder %s15_s16, 190   ;;  %s3340_s10 = smov %s2038_s11 }
 0xb1e   : > { %s3341_s11 = smov %s2149_s25  ;;  %s3342_s12 = smov %s2050_s14 }
 0xb1f   : > { %s3343_s13 = smov %s2054_s15  ;;  %s3344_s14 = smov %s3347_s19 }
 0xb20   : > { %s3345_s15 = smov %s3351_s20  ;;  %14 = sbr.rel (!%p12_p8) target bundleno = 5 (0x5), region = 76 }
 0xb25   :  { %1797 = vsyncpa [#allocation4], 1 }
 0xb26   :  { %1799 = vsyncpa [#allocation4 + $0x1], 1 }

</bundles_post_ra>
